<compile_context>
chip_gen: v6e
topology: v6e:2x2x1
jax: 0.10.0
libtpu: 0.0.40
codegen_flags: <defaults>
</compile_context>

<pallas_src>
import functools
from typing import NamedTuple

import jax
import jax.numpy as jnp
from jax.experimental import pallas as pl
from jax.experimental.pallas import tpu as pltpu


N1 = 1024                       # backbone feature width, padded up from 1000
TK_MAX = 2048                   # K (reduction) tile
VMEM_LIMIT = 48 * 1024 * 1024   # headroom under v7x's 64 MiB / TensorCore


def _round_up(x, m):
    return (x + m - 1) // m * m


class PrepMeta(NamedTuple):
    num_classes: int
    in_features: int
    f_pad: int
    tk: int
    c_pad: int      # 0 for the nn.Identity head


# ---------------------------------------------------------------------------
# Kernels
# ---------------------------------------------------------------------------
def _backbone_head_kernel(x_ref, w1_ref, b1_ref, w2_ref, b2_ref, o_ref, acc_ref):
    """Streams K tiles of (x @ w1); bias + Linear(1000->C) head at k == last."""
    k = pl.program_id(1)

    @pl.when(k == 0)
    def _():
        acc_ref[...] = jnp.zeros_like(acc_ref)

    # Inner loop: pure MXU accumulate (bf16 operands, f32 accumulation).
    acc_ref[...] += jnp.dot(
        x_ref[...], w1_ref[...], preferred_element_type=jnp.float32
    )

    @pl.when(k == pl.num_programs(1) - 1)
    def _():
        feat = acc_ref[...] + b1_ref[...]                        # (tm, 1024) f32
        out = jnp.dot(
            feat.astype(w2_ref.dtype), w2_ref[...],
            preferred_element_type=jnp.float32,
        ) + b2_ref[...]                                          # (tm, C_pad)
        o_ref[...] = out.astype(o_ref.dtype)


def _backbone_identity_kernel(x_ref, w1_ref, b1_ref, o_ref, acc_ref):
    """num_classes == 1000 path: backbone projection only (nn.Identity head).

    Grid is (M tiles, N blocks, K tiles): the N axis over the 1024 output
    columns is parallel, so v7x's two TensorCores split work even when the
    whole batch fits in a single M tile.
    """
    k = pl.program_id(2)

    @pl.when(k == 0)
    def _():
        acc_ref[...] = jnp.zeros_like(acc_ref)

    acc_ref[...] += jnp.dot(
        x_ref[...], w1_ref[...], preferred_element_type=jnp.float32
    )

    @pl.when(k == pl.num_programs(2) - 1)
    def _():
        o_ref[...] = (acc_ref[...] + b1_ref[...]).astype(o_ref.dtype)


# ---------------------------------------------------------------------------
# One-time parameter preparation (hoisted out of the forward pass)
# ---------------------------------------------------------------------------
def prepare_params(params, num_classes, in_features):
    """Pad weights to lane-dense tiles and cast to bf16 ONCE.

    This reads/writes the full weights, so it must not run per forward call.
    """
    w1, b1, w2, b2 = params
    F = in_features
    assert w1.shape == (F, 1000)

    tk = TK_MAX if F >= TK_MAX else _round_up(F, 128)
    f_pad = _round_up(F, tk)

    w1_p = jnp.pad(w1, ((0, f_pad - F), (0, N1 - 1000))).astype(jnp.bfloat16)
    b1_p = jnp.pad(b1.reshape(1, -1), ((0, 0), (0, N1 - 1000))).astype(jnp.float32)

    if num_classes == 1000:
        meta = PrepMeta(num_classes, F, f_pad, tk, 0)
        return (w1_p, b1_p, None, None), meta

    C = num_classes
    c_pad = _round_up(C, 128)
    w2_p = jnp.pad(w2, ((0, N1 - 1000), (0, c_pad - C))).astype(jnp.bfloat16)
    b2_p = jnp.pad(b2.reshape(1, -1), ((0, 0), (0, c_pad - C))).astype(jnp.float32)
    meta = PrepMeta(num_classes, F, f_pad, tk, c_pad)
    return (w1_p, b1_p, w2_p, b2_p), meta


# ---------------------------------------------------------------------------
# Forward
# ---------------------------------------------------------------------------
def model_factory_forward(x_nchw, weights, meta: PrepMeta, out_dtype=jnp.float32):
    """Forward of ModelFactory. x_nchw: (B, 3, H, W) float32."""
    assert x_nchw.shape[1] == 3, "Only three-channel data is supported."
    w1_p, b1_p, w2_p, b2_p = weights

    B = x_nchw.shape[0]
    x_flat = x_nchw.reshape(B, -1)                    # (B, F) glue reshape
    F = x_flat.shape[1]
    assert F == meta.in_features
    tk, f_pad = meta.tk, meta.f_pad

    # M tile: bigger tiles re-stream w1 fewer times for large batches;
    # >= 16 sublanes for bf16 packing at small batch.
    if B >= 256:
        tm = 256
    elif B >= 128:
        tm = 128
    else:
        tm = _round_up(B, 16)
    m_pad = _round_up(B, tm)
    m_tiles = m_pad // tm
    k_tiles = f_pad // tk

    # TODO(synk): for large B, feed x pre-flattened in bf16 (or fuse this into
    # the caller's jit) to avoid a full extra HBM pass over the activations.
    x_p = jnp.pad(x_flat, ((0, m_pad - B), (0, f_pad - F))).astype(jnp.bfloat16)

    if meta.num_classes == 1000:
        # nn.Identity head: skip the second matmul / w2 traffic.  Split the
        # 1024 output columns only when there is a single M tile (small batch)
        # so x is not re-streamed per N block at large batch.
        tn = 512 if m_tiles == 1 else N1
        n_tiles = N1 // tn
        out = pl.pallas_call(
            _backbone_identity_kernel,
            out_shape=jax.ShapeDtypeStruct((m_pad, N1), out_dtype),
            grid_spec=pltpu.PrefetchScalarGridSpec(
                num_scalar_prefetch=0,
                grid=(m_tiles, n_tiles, k_tiles),
                in_specs=[
                    pl.BlockSpec((tm, tk), lambda i, n, k: (i, k)),
                    pl.BlockSpec((tk, tn), lambda i, n, k: (k, n)),
                    pl.BlockSpec((1, tn), lambda i, n, k: (0, n)),
                ],
                out_specs=pl.BlockSpec((tm, tn), lambda i, n, k: (i, n)),
                scratch_shapes=[pltpu.VMEM((tm, tn), jnp.float32)],
            ),
            compiler_params=pltpu.CompilerParams(
                dimension_semantics=("parallel", "parallel", "arbitrary"),
                vmem_limit_bytes=VMEM_LIMIT,
            ),
        )(x_p, w1_p, b1_p)
        return out[:B, :1000]

    c_pad = meta.c_pad
    out = pl.pallas_call(
        _backbone_head_kernel,
        out_shape=jax.ShapeDtypeStruct((m_pad, c_pad), out_dtype),
        grid_spec=pltpu.PrefetchScalarGridSpec(
            num_scalar_prefetch=0,
            grid=(m_tiles, k_tiles),
            in_specs=[
                pl.BlockSpec((tm, tk), lambda i, k: (i, k)),
                pl.BlockSpec((tk, N1), lambda i, k: (k, 0)),
                pl.BlockSpec((1, N1), lambda i, k: (0, 0)),
                pl.BlockSpec((N1, c_pad), lambda i, k: (0, 0)),
                pl.BlockSpec((1, c_pad), lambda i, k: (0, 0)),
            ],
            out_specs=pl.BlockSpec((tm, c_pad), lambda i, k: (i, 0)),
            scratch_shapes=[pltpu.VMEM((tm, N1), jnp.float32)],
        ),
        compiler_params=pltpu.CompilerParams(
            dimension_semantics=("parallel", "arbitrary"),
            vmem_limit_bytes=VMEM_LIMIT,
        ),
    )(x_p, w1_p, b1_p, w2_p, b2_p)
    return out[:B, :meta.num_classes]


def init_params(in_features, num_classes):
    """Deterministic parameter init (synthetic stand-in; not a checkpoint)."""
    k = jax.random.PRNGKey(0)
    k1, k2, k3, k4 = jax.random.split(k, 4)
    w1 = jax.random.normal(k1, (in_features, 1000), jnp.float32) * 0.02
    b1 = jax.random.normal(k2, (1, 1000), jnp.float32) * 0.01
    if num_classes == 1000:
        return (w1, b1, None, None)     # nn.Identity head
    w2 = jax.random.normal(k3, (1000, num_classes), jnp.float32) * 0.02
    b2 = jax.random.normal(k4, (1, num_classes), jnp.float32) * 0.01
    return (w1, b1, w2, b2)


if __name__ == "__main__":
    B, C, H, W = 2, 3, 16, 16              # C must be 3 per the module's assert
    num_classes = 16                        # != 1000 -> Linear(1000, 16) head
    F = C * H * W

    key = jax.random.PRNGKey(0)
    x = jax.random.normal(key, (B, C, H, W), jnp.float32)
    x_bf16 = x.reshape(B, -1).astype(jnp.bfloat16)

    # --- head path (num_classes != 1000) ---
    params = init_params(F, num_classes)
    weights, meta = prepare_params(params, num_classes, F)     # one-time prep
    fwd = jax.jit(functools.partial(model_factory_forward, meta=meta))
    out = jax.block_until_ready(fwd(x, weights))

    w1, b1, w2, b2 = params
    ref_feat = jnp.dot(x_bf16, w1.astype(jnp.bfloat16),
                       preferred_element_type=jnp.float32) + b1
    ref = jnp.dot(ref_feat.astype(jnp.bfloat16), w2.astype(jnp.bfloat16),
                  preferred_element_type=jnp.float32) + b2
    assert out.shape == (B, num_classes)
    assert jnp.allclose(out, ref, atol=1e-2, rtol=1e-2)

    # --- Identity path (num_classes == 1000) ---
    params_id = init_params(F, 1000)
    weights_id, meta_id = prepare_params(params_id, 1000, F)
    fwd_id = jax.jit(functools.partial(model_factory_forward, meta=meta_id))
    out_id = jax.block_until_ready(fwd_id(x, weights_id))

    w1i, b1i, _, _ = params_id
    ref_id = jnp.dot(x_bf16, w1i.astype(jnp.bfloat16),
                     preferred_element_type=jnp.float32) + b1i
    assert out_id.shape == (B, 1000)
    assert jnp.allclose(out_id, ref_id, atol=1e-2, rtol=1e-2)

    print("KERNEL_OK")
</pallas_src>

<mosaic_0001>
module attributes {stable_mosaic.version = 11 : i64} {
  func.func @_backbone_head_kernel(%arg0: i32, %arg1: i32, %arg2: memref<16x768xbf16, #tpu.memory_space<vmem>>, %arg3: memref<768x1024xbf16, #tpu.memory_space<vmem>>, %arg4: memref<1x1024xf32, #tpu.memory_space<vmem>>, %arg5: memref<1024x128xbf16, #tpu.memory_space<vmem>>, %arg6: memref<1x128xf32, #tpu.memory_space<vmem>>, %arg7: memref<16x128xf32, #tpu.memory_space<vmem>>, %arg8: memref<16x1024xf32, #tpu.memory_space<vmem>>) attributes {dimension_semantics = [#tpu.dimension_semantics<parallel>, #tpu.dimension_semantics<arbitrary>], iteration_bounds = array<i64: 1, 1>, scalar_prefetch = 0 : i64, scratch_operands = 1 : i64, tpu.core_type = #tpu.core_type<tc>, window_params = [{transform_indices = @transform_0, window_bounds = array<i64: 16, 768>}, {transform_indices = @transform_1, window_bounds = array<i64: 768, 1024>}, {pipeline_mode = #tpu.pipeline_mode<synchronous>, transform_indices = @transform_2, window_bounds = array<i64: 1, 1024>}, {pipeline_mode = #tpu.pipeline_mode<synchronous>, transform_indices = @transform_3, window_bounds = array<i64: 1024, 128>}, {pipeline_mode = #tpu.pipeline_mode<synchronous>, transform_indices = @transform_4, window_bounds = array<i64: 1, 128>}, {transform_indices = @transform_5, window_bounds = array<i64: 16, 128>}]} {
    %c0_i32 = arith.constant 0 : i32
    %0 = arith.cmpi eq, %arg1, %c0_i32 : i32
    %1 = arith.extui %0 : i1 to i32
    %c0_i32_0 = arith.constant 0 : i32
    %2 = arith.cmpi ne, %1, %c0_i32_0 : i32
    scf.if %2 {
      %cst_10 = arith.constant 0.000000e+00 : f32
      %12 = vector.broadcast %cst_10 : f32 to vector<16x1024xf32>
      %c0_11 = arith.constant 0 : index
      %c0_12 = arith.constant 0 : index
      %13 = vector.load %arg8[%c0_11, %c0_12] : memref<16x1024xf32, #tpu.memory_space<vmem>>, vector<16x1024xf32>
      tpu.vector_store %arg8[%c0_11, %c0_12], %12 {strides = array<i32>} : memref<16x1024xf32, #tpu.memory_space<vmem>>, vector<16x1024xf32>,
    } else {
    }
    %c0 = arith.constant 0 : index
    %c0_1 = arith.constant 0 : index
    %3 = vector.load %arg8[%c0, %c0_1] : memref<16x1024xf32, #tpu.memory_space<vmem>>, vector<16x1024xf32>
    %c0_2 = arith.constant 0 : index
    %c0_3 = arith.constant 0 : index
    %4 = vector.load %arg2[%c0_2, %c0_3] : memref<16x768xbf16, #tpu.memory_space<vmem>>, vector<16x768xbf16>
    %c0_4 = arith.constant 0 : index
    %c0_5 = arith.constant 0 : index
    %5 = vector.load %arg3[%c0_4, %c0_5] : memref<768x1024xbf16, #tpu.memory_space<vmem>>, vector<768x1024xbf16>
    %cst = arith.constant dense<0.000000e+00> : vector<16x1024xf32>
    %6 = tpu.matmul %4, %5, %cst {dimension_numbers = #tpu.dot_dimension_numbers<[1], [0], [0], [1], [0, 0, 1, 1], [], []>} : vector<16x768xbf16>, vector<768x1024xbf16>, vector<16x1024xf32> -> vector<16x1024xf32>
    %7 = arith.addf %3, %6 : vector<16x1024xf32>
    %c0_6 = arith.constant 0 : index
    %c0_7 = arith.constant 0 : index
    %8 = vector.load %arg8[%c0_6, %c0_7] : memref<16x1024xf32, #tpu.memory_space<vmem>>, vector<16x1024xf32>
    tpu.vector_store %arg8[%c0_6, %c0_7], %7 {strides = array<i32>} : memref<16x1024xf32, #tpu.memory_space<vmem>>, vector<16x1024xf32>,
    %c0_i32_8 = arith.constant 0 : i32
    %9 = arith.cmpi eq, %arg1, %c0_i32_8 : i32
    %10 = arith.extui %9 : i1 to i32
    %c0_i32_9 = arith.constant 0 : i32
    %11 = arith.cmpi ne, %10, %c0_i32_9 : i32
    scf.if %11 {
      %c0_10 = arith.constant 0 : index
      %c0_11 = arith.constant 0 : index
      %12 = vector.load %arg8[%c0_10, %c0_11] : memref<16x1024xf32, #tpu.memory_space<vmem>>, vector<16x1024xf32>
      %c0_12 = arith.constant 0 : index
      %c0_13 = arith.constant 0 : index
      %13 = vector.load %arg4[%c0_12, %c0_13] : memref<1x1024xf32, #tpu.memory_space<vmem>>, vector<1x1024xf32>
      %14 = vector.broadcast %13 : vector<1x1024xf32> to vector<16x1024xf32>
      %15 = arith.addf %12, %14 : vector<16x1024xf32>
      %16 = arith.truncf %15 : vector<16x1024xf32> to vector<16x1024xbf16>
      %c0_14 = arith.constant 0 : index
      %c0_15 = arith.constant 0 : index
      %17 = vector.load %arg5[%c0_14, %c0_15] : memref<1024x128xbf16, #tpu.memory_space<vmem>>, vector<1024x128xbf16>
      %cst_16 = arith.constant dense<0.000000e+00> : vector<16x128xf32>
      %18 = tpu.matmul %16, %17, %cst_16 {dimension_numbers = #tpu.dot_dimension_numbers<[1], [0], [0], [1], [0, 0, 1, 1], [], []>} : vector<16x1024xbf16>, vector<1024x128xbf16>, vector<16x128xf32> -> vector<16x128xf32>
      %c0_17 = arith.constant 0 : index
      %c0_18 = arith.constant 0 : index
      %19 = vector.load %arg6[%c0_17, %c0_18] : memref<1x128xf32, #tpu.memory_space<vmem>>, vector<1x128xf32>
      %20 = vector.broadcast %19 : vector<1x128xf32> to vector<16x128xf32>
      %21 = arith.addf %18, %20 : vector<16x128xf32>
      %c0_19 = arith.constant 0 : index
      %c0_20 = arith.constant 0 : index
      %22 = vector.load %arg7[%c0_19, %c0_20] : memref<16x128xf32, #tpu.memory_space<vmem>>, vector<16x128xf32>
      tpu.vector_store %arg7[%c0_19, %c0_20], %21 {strides = array<i32>} : memref<16x128xf32, #tpu.memory_space<vmem>>, vector<16x128xf32>,
    } else {
    }
    return
  }
  func.func @transform_0(%arg0: i32, %arg1: i32) -> (i32, i32) {
    %c0_i32 = arith.constant 0 : i32
    return %arg0, %arg1 : i32, i32
  }
  func.func @transform_1(%arg0: i32, %arg1: i32) -> (i32, i32) {
    %c0_i32 = arith.constant 0 : i32
    %c0_i32_0 = arith.constant 0 : i32
    return %arg1, %c0_i32 : i32, i32
  }
  func.func @transform_2(%arg0: i32, %arg1: i32) -> (i32, i32) {
    %c0_i32 = arith.constant 0 : i32
    %c0_i32_0 = arith.constant 0 : i32
    %c0_i32_1 = arith.constant 0 : i32
    return %c0_i32, %c0_i32_0 : i32, i32
  }
  func.func @transform_3(%arg0: i32, %arg1: i32) -> (i32, i32) {
    %c0_i32 = arith.constant 0 : i32
    %c0_i32_0 = arith.constant 0 : i32
    %c0_i32_1 = arith.constant 0 : i32
    return %c0_i32, %c0_i32_0 : i32, i32
  }
  func.func @transform_4(%arg0: i32, %arg1: i32) -> (i32, i32) {
    %c0_i32 = arith.constant 0 : i32
    %c0_i32_0 = arith.constant 0 : i32
    %c0_i32_1 = arith.constant 0 : i32
    return %c0_i32, %c0_i32_0 : i32, i32
  }
  func.func @transform_5(%arg0: i32, %arg1: i32) -> (i32, i32) {
    %c0_i32 = arith.constant 0 : i32
    %c0_i32_0 = arith.constant 0 : i32
    return %arg0, %c0_i32 : i32, i32
  }
}

</mosaic_0001>

<bundles_post_ra>
// kernel: model_factory_forward.1
= control target key start
LH: loop header
LB: loop body
LE: loop exit
PB: predicated region body
PF: predicated region fallthrough
CT: control target
= control target key end

     0   :  { %10 = vsyncpa [#allocation4], 0  ;;  %s4682_s0 = inlined_call_operand.vmem [shape: bf16[16,768], index: 0, kind: input, shape index: {}]   ;;  %s4683_s1 = inlined_call_operand.hbm [shape: bf16[768,1024], index: 1, kind: input, shape index: {}]   ;;  %s4684_s2 = inlined_call_operand.hbm [shape: f32[1,1024], index: 2, kind: input, shape index: {}]   ;;  %s4685_s3 = inlined_call_operand.hbm [shape: bf16[1024,128], index: 3, kind: input, shape index: {}]   ;;  %s4686_s4 = inlined_call_operand.hbm [shape: f32[1,128], index: 4, kind: input, shape index: {}]   ;;  %s4687_s5 = inlined_call_operand.vmem [shape: f32[16,128], index: 5, kind: output, shape index: {}]  }
   0x1   :  { %11 = vsyncpa [#allocation6], 0 }
   0x2   :  { %12 = vsyncpa [#allocation9], 0  ;;  %s4490_s18 = smov [#allocation5]   ;;  %s4491_s20 = smov [#allocation3]  }
   0x3   :  { %s33_s19 = sshll.u32 %s4490_s18, 4  ;;  %s20_s21 = sshll.u32 %s4491_s20, 4  ;;  %s34_s19 = int_to_ptr.vmem [resolvable:$true] %s33_s19  ;;  %s21_s21 = int_to_ptr.vmem [resolvable:$true] %s20_s21 }
   0x4   :  { %s4412_s22 = scalar_lea.vmem %s34_s19, 128  ;;  %p4417_p1 = scmp.lt.s32.totalorder %s34_s19, %s34_s19 }
   0x5   :  { %p4413_p0 = scmp.ne.s32.totalorder %s34_s19, %s4412_s22  ;;  %p4418_p2 = scmp.lt.s32.totalorder %s4412_s22, %s4412_s22 }
   0x7   :  { %p4419_p3 = por %p4418_p2, %p4417_p1 }
   0x9   :  { %p4420_p4 = pnand %p4419_p3, %p4413_p0 }
   0xb   :  { %4423 = shalt.err (!%p4420_p4)
}
   0xc   :  { %36 = dma.hbm_to_vmem [thread:$0]  %s4684_s2, 128, %s34_s19, [#allocation6]  }
   0xd   :  { %s4432_s25 = scalar_lea.vmem %s21_s21, 49152  ;;  %p4437_p6 = scmp.lt.s32.totalorder %s21_s21, %s21_s21 }
   0xe   :  { %p4433_p5 = scmp.ne.s32.totalorder %s21_s21, %s4432_s25  ;;  %p4438_p7 = scmp.lt.s32.totalorder %s4432_s25, %s4432_s25 }
  0x10   :  { %p4439_p8 = por %p4438_p7, %p4437_p6 }
  0x12   :  { %p4440_p9 = pnand %p4439_p8, %p4433_p5 }
  0x14   :  { %4443 = shalt.err (!%p4440_p9)
}
  0x15   :  { %s4492_s26 = smov 512   ;;  %s4493_s27 = smov 32  }
  0x16   :  { %26 = dma.hbm_to_vmem [thread:$0]  %s4683_s1, 49152, %s21_s21, [#allocation4], %s4492_s26, %s4492_s26, %s4493_s27  }
  0x17   :  { %s4494_s30 = smov [#allocation7]  }
  0x18   :  { %s42_s6 = sshll.u32 %s4494_s30, 4  ;;  %s43_s6 = int_to_ptr.vmem [resolvable:$true] %s42_s6 }
  0x19   :  { %s4452_s7 = scalar_lea.vmem %s43_s6, 8192  ;;  %p4457_p11 = scmp.lt.s32.totalorder %s43_s6, %s43_s6 }
  0x1a   :  { %p4453_p10 = scmp.ne.s32.totalorder %s43_s6, %s4452_s7  ;;  %p4458_p12 = scmp.lt.s32.totalorder %s4452_s7, %s4452_s7 }
  0x1c   :  { %p4459_p13 = por %p4458_p12, %p4457_p11 }
  0x1e   :  { %p4460_p0 = pnand %p4459_p13, %p4453_p10 }
  0x20   :  { %4463 = shalt.err (!%p4460_p0)
}
  0x21   :  { %s4495_s2 = smov 64   ;;  %s4496_s8 = smov 4  }
  0x22   :  { %48 = dma.hbm_to_vmem [thread:$0]  %s4685_s3, 8192, %s43_s6, [#allocation6], %s4495_s2, %s4495_s2, %s4496_s8  }
  0x23   :  { %s4497_s11 = smov [#allocation8]  }
  0x24   :  { %s55_s12 = sshll.u32 %s4497_s11, 4  ;;  %s56_s12 = int_to_ptr.vmem [resolvable:$true] %s55_s12 }
  0x25   :  { %s4472_s1 = scalar_lea.vmem %s56_s12, 16  ;;  %s4476_s13 = scalar_lea.vmem %s56_s12, 32 }
  0x26   :  { %p4473_p1 = scmp.ne.s32.totalorder %s56_s12, %s4472_s1  ;;  %p4477_p2 = scmp.lt.s32.totalorder %s56_s12, %s56_s12 }
  0x27   :  { %p4478_p3 = scmp.lt.s32.totalorder %s4476_s13, %s4472_s1 }
  0x29   :  { %p4479_p4 = por %p4478_p3, %p4477_p2 }
  0x2b   :  { %p4480_p5 = pnand %p4479_p4, %p4473_p1 }
  0x2d   :  { %4483 = shalt.err (!%p4480_p5)
}
  0x2e   :  { %58 = dma.hbm_to_vmem [thread:$0]  %s4686_s4, 16, %s56_s12, [#allocation9]  }
  0x2f   :  { %4484 = dma.done.wait [#allocation4], 49152  }
  0x30   :  { %4485 = vsyncadd [#allocation4], 4294918144 }
  0x31   :  { %4486 = dma.done.wait [#allocation6], 8320  }
  0x32   :  { %4487 = vsyncadd [#allocation6], 4294958976 }
  0x33   :  { %4488 = dma.done.wait [#allocation9], 16  }
  0x34   :  { %4489 = vsyncadd [#allocation9], 4294967280  ;;  %v170_v0 = vld [vmem:[#allocation3 + $0x1c0] sm:$0xff] }
  0x35   :  { %v174_v1 = vld [vmem:[#allocation3 + $0x1e0] sm:$0xff] }
  0x36   :  { %v298_v2 = vld [vmem:[#allocation3 + $0x5c0] sm:$0xff]  ;;  %v3836_v3 = vcombine.high %v170_v0, %v174_v1  ;;  %v3835_v5 = vcombine.low %v170_v0, %v174_v1 }
  0x37   :  { %v302_v4 = vld [vmem:[#allocation3 + $0x5e0] sm:$0xff] }
  0x38   :  { %v162_v6 = vld [vmem:[#allocation3 + $0x180] sm:$0xff]  ;;  %v3964_v8 = vcombine.high %v298_v2, %v302_v4  ;;  %v3963_v9 = vcombine.low %v298_v2, %v302_v4  ;;  %2448 = vmatprep.subr.bf16.mxu0 %v3836_v3 }
  0x39   :  { %v166_v7 = vld [vmem:[#allocation3 + $0x1a0] sm:$0xff]  ;;  %2449 = vmatpush1.bf16.msra.mxu0 %v3835_v5 }
  0x3a   :  { %v3828_v10 = vcombine.high %v162_v6, %v166_v7  ;;  %v290_v11 = vld [vmem:[#allocation3 + $0x580] sm:$0xff]  ;;  %2491 = vmatprep.subr.bf16.mxu1 %v3964_v8  ;;  %v3827_v18 = vcombine.low %v162_v6, %v166_v7 }
  0x3b   :  { %v294_v12 = vld [vmem:[#allocation3 + $0x5a0] sm:$0xff]  ;;  %2492 = vmatpush1.bf16.msra.mxu1 %v3963_v9 }
  0x3c   :  { %v154_v13 = vld [vmem:[#allocation3 + $0x140] sm:$0xff]  ;;  %v3956_v14 = vcombine.high %v290_v11, %v294_v12  ;;  %2450 = vmatprep.subr.bf16.mxu0 %v3828_v10  ;;  %v3955_v19 = vcombine.low %v290_v11, %v294_v12 }
  0x3d   :  { %v158_v15 = vld [vmem:[#allocation3 + $0x160] sm:$0xff]  ;;  %2451 = vmatpush1.bf16.msra.mxu0 %v3827_v18 }
  0x3e   :  { %v282_v16 = vld [vmem:[#allocation3 + $0x540] sm:$0xff]  ;;  %v3820_v20 = vcombine.high %v154_v13, %v158_v15  ;;  %2493 = vmatprep.subr.bf16.mxu1 %v3956_v14  ;;  %v3819_v26 = vcombine.low %v154_v13, %v158_v15 }
  0x3f   :  { %v286_v17 = vld [vmem:[#allocation3 + $0x560] sm:$0xff]  ;;  %2494 = vmatpush1.bf16.msra.mxu1 %v3955_v19 }
  0x40   :  { %v3948_v21 = vcombine.high %v282_v16, %v286_v17  ;;  %v146_v22 = vld [vmem:[#allocation3 + $0x100] sm:$0xff]  ;;  %2452 = vmatprep.subr.bf16.mxu0 %v3820_v20  ;;  %v3947_v27 = vcombine.low %v282_v16, %v286_v17 }
  0x41   :  { %v150_v23 = vld [vmem:[#allocation3 + $0x120] sm:$0xff]  ;;  %2453 = vmatpush1.bf16.msra.mxu0 %v3819_v26 }
  0x42   :  { %v274_v24 = vld [vmem:[#allocation3 + $0x500] sm:$0xff]  ;;  %v3812_v28 = vcombine.high %v146_v22, %v150_v23  ;;  %2495 = vmatprep.subr.bf16.mxu1 %v3948_v21  ;;  %v3811_v34 = vcombine.low %v146_v22, %v150_v23 }
  0x43   :  { %v278_v25 = vld [vmem:[#allocation3 + $0x520] sm:$0xff]  ;;  %2496 = vmatpush1.bf16.msra.mxu1 %v3947_v27 }
  0x44   :  { %v3940_v29 = vcombine.high %v274_v24, %v278_v25  ;;  %v138_v30 = vld [vmem:[#allocation3 + $0xc0] sm:$0xff]  ;;  %2454 = vmatprep.subr.bf16.mxu0 %v3812_v28  ;;  %v3939_v35 = vcombine.low %v274_v24, %v278_v25 }
  0x45   :  { %v142_v31 = vld [vmem:[#allocation3 + $0xe0] sm:$0xff]  ;;  %2455 = vmatpush1.bf16.msra.mxu0 %v3811_v34 }
  0x46   :  { %v266_v32 = vld [vmem:[#allocation3 + $0x4c0] sm:$0xff]  ;;  %v3804_v36 = vcombine.high %v138_v30, %v142_v31  ;;  %2497 = vmatprep.subr.bf16.mxu1 %v3940_v29  ;;  %v3803_v42 = vcombine.low %v138_v30, %v142_v31 }
  0x47   :  { %v270_v33 = vld [vmem:[#allocation3 + $0x4e0] sm:$0xff]  ;;  %2498 = vmatpush1.bf16.msra.mxu1 %v3939_v35 }
  0x48   :  { %v3932_v37 = vcombine.high %v266_v32, %v270_v33  ;;  %v130_v38 = vld [vmem:[#allocation3 + $0x80] sm:$0xff]  ;;  %2456 = vmatprep.subr.bf16.mxu0 %v3804_v36  ;;  %v3931_v43 = vcombine.low %v266_v32, %v270_v33 }
  0x49   :  { %v134_v39 = vld [vmem:[#allocation3 + $0xa0] sm:$0xff]  ;;  %2457 = vmatpush1.bf16.msra.mxu0 %v3803_v42 }
  0x4a   :  { %v258_v40 = vld [vmem:[#allocation3 + $0x480] sm:$0xff]  ;;  %v3796_v44 = vcombine.high %v130_v38, %v134_v39  ;;  %2499 = vmatprep.subr.bf16.mxu1 %v3932_v37  ;;  %v3795_v50 = vcombine.low %v130_v38, %v134_v39 }
  0x4b   :  { %v262_v41 = vld [vmem:[#allocation3 + $0x4a0] sm:$0xff]  ;;  %2500 = vmatpush1.bf16.msra.mxu1 %v3931_v43 }
  0x4c   :  { %v3924_v45 = vcombine.high %v258_v40, %v262_v41  ;;  %v122_v46 = vld [vmem:[#allocation3 + $0x40] sm:$0xff]  ;;  %2458 = vmatprep.subr.bf16.mxu0 %v3796_v44  ;;  %v3923_v52 = vcombine.low %v258_v40, %v262_v41 }
  0x4d   :  { %v126_v47 = vld [vmem:[#allocation3 + $0x60] sm:$0xff]  ;;  %2459 = vmatpush1.bf16.msra.mxu0 %v3795_v50 }
  0x4e   :  { %v250_v48 = vld [vmem:[#allocation3 + $0x440] sm:$0xff]  ;;  %v3788_v53 = vcombine.high %v122_v46, %v126_v47  ;;  %2501 = vmatprep.subr.bf16.mxu1 %v3924_v45  ;;  %v3787_v60 = vcombine.low %v122_v46, %v126_v47 }
  0x4f   :  { %v254_v49 = vld [vmem:[#allocation3 + $0x460] sm:$0xff]  ;;  %2502 = vmatpush1.bf16.msra.mxu1 %v3923_v52 }
  0x50   :  { %v114_v51 = vld [vmem:[#allocation3] sm:$0xff]  ;;  %v3916_v55 = vcombine.high %v250_v48, %v254_v49  ;;  %2460 = vmatprep.subr.bf16.mxu0 %v3788_v53  ;;  %v3915_v61 = vcombine.low %v250_v48, %v254_v49 }
  0x51   :  { %v118_v54 = vld [vmem:[#allocation3 + $0x20] sm:$0xff]  ;;  %2461 = vmatpush1.bf16.msra.mxu0 %v3787_v60 }
  0x52   :  { %v4543_v56 = vld [vmem:[%s4682_s0 + $0x4] ss:$24 sps:$4 sm:$0xff]   ;;  %v3780_v62 = vcombine.high %v114_v51, %v118_v54  ;;  %2503 = vmatprep.subr.bf16.mxu1 %v3916_v55  ;;  %v3779_v4 = vcombine.low %v114_v51, %v118_v54 }
  0x53   :  { %v242_v57 = vld [vmem:[#allocation3 + $0x400] sm:$0xff]  ;;  %2480 = vmatprep.mubr.bf16.mxu0 %v4543_v56  ;;  %2504 = vmatpush1.bf16.msra.mxu1 %v3915_v61 }
  0x54   :  { %v246_v58 = vld [vmem:[#allocation3 + $0x420] sm:$0xff]  ;;  %2462 = vmatprep.subr.bf16.mxu0 %v3780_v62 }
  0x55   :  { %v4548_v59 = vld [vmem:[%s4682_s0 + $0xc] ss:$24 sps:$4 sm:$0xff]   ;;  %v3908_v63 = vcombine.high %v242_v57, %v246_v58  ;;  %v3907_v5 = vcombine.low %v242_v57, %v246_v58  ;;  %2463 = vmatpush1.bf16.msra.mxu0 %v3779_v4 }
  0x56   :  { %v234_v0 = vld [vmem:[#allocation3 + $0x3c0] sm:$0xff]  ;;  %2523 = vmatprep.mubr.bf16.mxu1 %v4548_v59  ;;  %v171_v4 = vld [vmem:[#allocation3 + $0x1c8] sm:$0xff] }
  0x57   :  { %v238_v1 = vld [vmem:[#allocation3 + $0x3e0] sm:$0xff]  ;;  %2505 = vmatprep.subr.bf16.mxu1 %v3908_v63 }
  0x58   :  { %v362_v2 = vld [vmem:[#allocation3 + $0x7c0] sm:$0xff]  ;;  %v3900_v6 = vcombine.high %v234_v0, %v238_v1  ;;  %v3899_v12 = vcombine.low %v234_v0, %v238_v1  ;;  %2506 = vmatpush1.bf16.msra.mxu1 %v3907_v5  ;;  %v175_v5 = vld [vmem:[#allocation3 + $0x1e8] sm:$0xff] }
  0x59   :  { %v366_v3 = vld [vmem:[#allocation3 + $0x7e0] sm:$0xff] }
  0x5a   :  { %v4028_v7 = vcombine.high %v362_v2, %v366_v3  ;;  %v226_v8 = vld [vmem:[#allocation3 + $0x380] sm:$0xff]  ;;  %2464 = vmatprep.subr.bf16.mxu0 %v3900_v6  ;;  %v4027_v13 = vcombine.low %v362_v2, %v366_v3 }
  0x5b   :  { %v230_v9 = vld [vmem:[#allocation3 + $0x3a0] sm:$0xff]  ;;  %2465 = vmatpush2.bf16.msra.mxu0 %v3899_v12 }
  0x5c   :  { %v354_v10 = vld [vmem:[#allocation3 + $0x780] sm:$0xff]  ;;  %v3892_v14 = vcombine.high %v226_v8, %v230_v9  ;;  %2507 = vmatprep.subr.bf16.mxu1 %v4028_v7  ;;  %v3891_v20 = vcombine.low %v226_v8, %v230_v9  ;;  %v3838_v9 = vcombine.high %v171_v4, %v175_v5 }
  0x5d   :  { %v358_v11 = vld [vmem:[#allocation3 + $0x7a0] sm:$0xff]  ;;  %2508 = vmatpush2.bf16.msra.mxu1 %v4027_v13  ;;  %v163_v13 = vld [vmem:[#allocation3 + $0x188] sm:$0xff] }
  0x5e   :  { %v4020_v15 = vcombine.high %v354_v10, %v358_v11  ;;  %v218_v16 = vld [vmem:[#allocation3 + $0x340] sm:$0xff]  ;;  %2466 = vmatprep.subr.bf16.mxu0 %v3892_v14  ;;  %v4019_v21 = vcombine.low %v354_v10, %v358_v11  ;;  %v167_v14 = vld [vmem:[#allocation3 + $0x1a8] sm:$0xff] }
  0x5f   :  { %v222_v17 = vld [vmem:[#allocation3 + $0x360] sm:$0xff]  ;;  %2467 = vmatpush2.bf16.msra.mxu0 %v3891_v20 }
  0x60   :  { %v346_v18 = vld [vmem:[#allocation3 + $0x740] sm:$0xff]  ;;  %v3884_v22 = vcombine.high %v218_v16, %v222_v17  ;;  %2509 = vmatprep.subr.bf16.mxu1 %v4020_v15  ;;  %v3883_v28 = vcombine.low %v218_v16, %v222_v17  ;;  %v3837_v17 = vcombine.low %v171_v4, %v175_v5 }
  0x61   :  { %v350_v19 = vld [vmem:[#allocation3 + $0x760] sm:$0xff]  ;;  %2510 = vmatpush2.bf16.msra.mxu1 %v4019_v21 }
  0x62   :  { %v4012_v23 = vcombine.high %v346_v18, %v350_v19  ;;  %v210_v24 = vld [vmem:[#allocation3 + $0x300] sm:$0xff]  ;;  %2468 = vmatprep.subr.bf16.mxu0 %v3884_v22  ;;  %v4011_v29 = vcombine.low %v346_v18, %v350_v19  ;;  %v3830_v19 = vcombine.high %v163_v13, %v167_v14  ;;  %v4563_v22 = vld [vmem:[%s4682_s0 + $0x14] ss:$24 sps:$4 sm:$0xff]  }
  0x63   :  { %v214_v25 = vld [vmem:[#allocation3 + $0x320] sm:$0xff]  ;;  %2469 = vmatpush2.bf16.msra.mxu0 %v3883_v28 }
  0x64   :  { %v338_v26 = vld [vmem:[#allocation3 + $0x700] sm:$0xff]  ;;  %v3876_v30 = vcombine.high %v210_v24, %v214_v25  ;;  %2511 = vmatprep.subr.bf16.mxu1 %v4012_v23  ;;  %v3875_v36 = vcombine.low %v210_v24, %v214_v25  ;;  %v155_v23 = vld [vmem:[#allocation3 + $0x148] sm:$0xff] }
  0x65   :  { %v342_v27 = vld [vmem:[#allocation3 + $0x720] sm:$0xff]  ;;  %2512 = vmatpush2.bf16.msra.mxu1 %v4011_v29  ;;  %v159_v24 = vld [vmem:[#allocation3 + $0x168] sm:$0xff] }
  0x66   :  { %v4004_v31 = vcombine.high %v338_v26, %v342_v27  ;;  %v202_v32 = vld [vmem:[#allocation3 + $0x2c0] sm:$0xff]  ;;  %2470 = vmatprep.subr.bf16.mxu0 %v3876_v30  ;;  %v4003_v37 = vcombine.low %v338_v26, %v342_v27  ;;  %v3829_v26 = vcombine.low %v163_v13, %v167_v14  ;;  %v3822_v30 = vcombine.high %v155_v23, %v159_v24 }
  0x67   :  { %v206_v33 = vld [vmem:[#allocation3 + $0x2e0] sm:$0xff]  ;;  %2471 = vmatpush2.bf16.msra.mxu0 %v3875_v36 }
  0x68   :  { %v330_v34 = vld [vmem:[#allocation3 + $0x6c0] sm:$0xff]  ;;  %v3868_v38 = vcombine.high %v202_v32, %v206_v33  ;;  %2513 = vmatprep.subr.bf16.mxu1 %v4004_v31  ;;  %v3867_v44 = vcombine.low %v202_v32, %v206_v33  ;;  %v147_v31 = vld [vmem:[#allocation3 + $0x108] sm:$0xff] }
  0x69   :  { %v334_v35 = vld [vmem:[#allocation3 + $0x6e0] sm:$0xff]  ;;  %2514 = vmatpush2.bf16.msra.mxu1 %v4003_v37  ;;  %v151_v32 = vld [vmem:[#allocation3 + $0x128] sm:$0xff] }
  0x6a   :  { %v3996_v39 = vcombine.high %v330_v34, %v334_v35  ;;  %v194_v40 = vld [vmem:[#allocation3 + $0x280] sm:$0xff]  ;;  %2472 = vmatprep.subr.bf16.mxu0 %v3868_v38  ;;  %v3995_v45 = vcombine.low %v330_v34, %v334_v35  ;;  %v3821_v34 = vcombine.low %v155_v23, %v159_v24  ;;  %v139_v38 = vld [vmem:[#allocation3 + $0xc8] sm:$0xff] }
  0x6b   :  { %v198_v41 = vld [vmem:[#allocation3 + $0x2a0] sm:$0xff]  ;;  %2473 = vmatpush2.bf16.msra.mxu0 %v3867_v44 }
  0x6c   :  { %v322_v42 = vld [vmem:[#allocation3 + $0x680] sm:$0xff]  ;;  %v3860_v46 = vcombine.high %v194_v40, %v198_v41  ;;  %2515 = vmatprep.subr.bf16.mxu1 %v3996_v39  ;;  %v3859_v52 = vcombine.low %v194_v40, %v198_v41  ;;  %v3814_v39 = vcombine.high %v147_v31, %v151_v32  ;;  %v143_v40 = vld [vmem:[#allocation3 + $0xe8] sm:$0xff] }
  0x6d   :  { %v326_v43 = vld [vmem:[#allocation3 + $0x6a0] sm:$0xff]  ;;  %2516 = vmatpush2.bf16.msra.mxu1 %v3995_v45  ;;  %v131_v45 = vld [vmem:[#allocation3 + $0x88] sm:$0xff] }
  0x6e   :  { %v3988_v47 = vcombine.high %v322_v42, %v326_v43  ;;  %v186_v48 = vld [vmem:[#allocation3 + $0x240] sm:$0xff]  ;;  %2474 = vmatprep.subr.bf16.mxu0 %v3860_v46  ;;  %v3987_v53 = vcombine.low %v322_v42, %v326_v43  ;;  %v3813_v42 = vcombine.low %v147_v31, %v151_v32  ;;  %v3806_v46 = vcombine.high %v139_v38, %v143_v40 }
  0x6f   :  { %v190_v49 = vld [vmem:[#allocation3 + $0x260] sm:$0xff]  ;;  %2475 = vmatpush2.bf16.msra.mxu0 %v3859_v52 }
  0x70   :  { %v314_v50 = vld [vmem:[#allocation3 + $0x640] sm:$0xff]  ;;  %v3852_v54 = vcombine.high %v186_v48, %v190_v49  ;;  %2517 = vmatprep.subr.bf16.mxu1 %v3988_v47  ;;  %v3851_v62 = vcombine.low %v186_v48, %v190_v49  ;;  %v135_v47 = vld [vmem:[#allocation3 + $0xa8] sm:$0xff]  ;;  %v3805_v49 = vcombine.low %v139_v38, %v143_v40 }
  0x71   :  { %v318_v51 = vld [vmem:[#allocation3 + $0x660] sm:$0xff]  ;;  %2518 = vmatpush2.bf16.msra.mxu1 %v3987_v53  ;;  %v123_v53 = vld [vmem:[#allocation3 + $0x48] sm:$0xff] }
  0x72   :  { %v3980_v55 = vcombine.high %v314_v50, %v318_v51  ;;  %v178_v57 = vld [vmem:[#allocation3 + $0x200] sm:$0xff]  ;;  %2476 = vmatprep.subr.bf16.mxu0 %v3852_v54  ;;  %v3979_v63 = vcombine.low %v314_v50, %v318_v51  ;;  %v3798_v54 = vcombine.high %v131_v45, %v135_v47 }
  0x73   :  { %v182_v58 = vld [vmem:[#allocation3 + $0x220] sm:$0xff]  ;;  %2477 = vmatpush2.bf16.msra.mxu0 %v3851_v62 }
  0x74   :  { %v306_v60 = vld [vmem:[#allocation3 + $0x600] sm:$0xff]  ;;  %v3844_v0 = vcombine.high %v178_v57, %v182_v58  ;;  %2519 = vmatprep.subr.bf16.mxu1 %v3980_v55  ;;  %v3843_v6 = vcombine.low %v178_v57, %v182_v58  ;;  %v127_v55 = vld [vmem:[#allocation3 + $0x68] sm:$0xff]  ;;  %v3797_v58 = vcombine.low %v131_v45, %v135_v47 }
  0x75   :  { %v310_v61 = vld [vmem:[#allocation3 + $0x620] sm:$0xff]  ;;  %2520 = vmatpush2.bf16.msra.mxu1 %v3979_v63  ;;  %v115_v63 = vld [vmem:[#allocation3 + $0x8] sm:$0xff] }
  0x76   :  { %v3972_v1 = vcombine.high %v306_v60, %v310_v61  ;;  %v426_v2 = vld [vmem:[#allocation3 + $0x9c0] sm:$0xff]  ;;  %2478 = vmatprep.subr.bf16.mxu0 %v3844_v0  ;;  %v3971_v7 = vcombine.low %v306_v60, %v310_v61  ;;  %v3790_v0 = vcombine.high %v123_v53, %v127_v55 }
  0x77   :  { %v430_v3 = vld [vmem:[#allocation3 + $0x9e0] sm:$0xff]  ;;  %2479 = vmatpush2.bf16.msra.mxu0 %v3843_v6 }
  0x78   :  { %v4092_v8 = vcombine.high %v426_v2, %v430_v3  ;;  %2521 = vmatprep.subr.bf16.mxu1 %v3972_v1  ;;  %v418_v10 = vld [vmem:[#allocation3 + $0x980] sm:$0xff]  ;;  %v4091_v16 = vcombine.low %v426_v2, %v430_v3  ;;  %v119_v1 = vld [vmem:[#allocation3 + $0x28] sm:$0xff]  ;;  %v3789_v3 = vcombine.low %v123_v53, %v127_v55 }
  0x79   :  { %v422_v11 = vld [vmem:[#allocation3 + $0x9a0] sm:$0xff]  ;;  %2522 = vmatpush2.bf16.msra.mxu1 %v3971_v7  ;;  %v235_v7 = vld [vmem:[#allocation3 + $0x3c8] sm:$0xff] }
  0x7a   :  { %v4555_v12 = vld [vmem:[%s4682_s0] ss:$24 sps:$4 sm:$0xff]   ;;  %2534 = vmatprep.subr.bf16.mxu0 %v4092_v8  ;;  %v4084_v18 = vcombine.high %v418_v10, %v422_v11  ;;  %2577 = vmatprep.subr.bf16.mxu1 %v3838_v9  ;;  %v4083_v25 = vcombine.low %v418_v10, %v422_v11  ;;  %v3782_v8 = vcombine.high %v115_v63, %v119_v1  ;;  %v239_v9 = vld [vmem:[#allocation3 + $0x3e8] sm:$0xff] }
  0x7b   :  { %v4329_v15 = vld [vmem:[%s4682_s0 + $0x8] ss:$24 sps:$4 sm:$0xff]   ;;  %2481 = vmatmul.mubr.bf16.vlgmr.msra.gmra.mxu0 %v4555_v12  ;;  %v3781_v11 = vcombine.low %v115_v63, %v119_v1 }
  0x7c   :  { %v410_v20 = vld [vmem:[#allocation3 + $0x940] sm:$0xff]  ;;  %2524 = vmatmul.mubr.bf16.vlgmr.msra.gmra.mxu1 %v4329_v15  ;;  %2535 = vmatpush1.bf16.msra.mxu0 %v4091_v16  ;;  %v227_v16 = vld [vmem:[#allocation3 + $0x388] sm:$0xff] }
  0x7d   :  { %v414_v21 = vld [vmem:[#allocation3 + $0x960] sm:$0xff]  ;;  %2578 = vmatpush1.bf16.msra.mxu1 %v3837_v17  ;;  %2536 = vmatprep.subr.bf16.mxu0 %v4084_v18  ;;  %v3902_v17 = vcombine.high %v235_v7, %v239_v9  ;;  %v231_v18 = vld [vmem:[#allocation3 + $0x3a8] sm:$0xff] }
  0x7e   :  { %v4076_v27 = vcombine.high %v410_v20, %v414_v21  ;;  %v402_v28 = vld [vmem:[#allocation3 + $0x900] sm:$0xff]  ;;  %2579 = vmatprep.subr.bf16.mxu1 %v3830_v19  ;;  %2566 = vmatprep.mubr.bf16.mxu0 %v4563_v22  ;;  %v4075_v33 = vcombine.low %v410_v20, %v414_v21  ;;  %v3901_v20 = vcombine.low %v235_v7, %v239_v9  ;;  %v303_v9 = vld [vmem:[#allocation3 + $0x5e8] sm:$0xff] }
  0x7f   :  { %v406_v29 = vld [vmem:[#allocation3 + $0x920] sm:$0xff]  ;;  %2609 = vmatprep.mubr.bf16.mxu1 %v4543_v56 }
  0x80   :  { %2537 = vmatpush1.bf16.msra.mxu0 %v4083_v25  ;;  %v4068_v35 = vcombine.high %v402_v28, %v406_v29  ;;  %v394_v36 = vld [vmem:[#allocation3 + $0x8c0] sm:$0xff]  ;;  %v4067_v41 = vcombine.low %v402_v28, %v406_v29  ;;  %v219_v25 = vld [vmem:[#allocation3 + $0x348] sm:$0xff]  ;;  %v3893_v29 = vcombine.low %v227_v16, %v231_v18 }
  0x81   :  { %2580 = vmatpush1.bf16.msra.mxu1 %v3829_v26  ;;  %2538 = vmatprep.subr.bf16.mxu0 %v4076_v27  ;;  %v398_v37 = vld [vmem:[#allocation3 + $0x8e0] sm:$0xff]  ;;  %v3894_v26 = vcombine.high %v227_v16, %v231_v18  ;;  %v223_v27 = vld [vmem:[#allocation3 + $0x368] sm:$0xff] }
  0x82   :  { %2581 = vmatprep.subr.bf16.mxu1 %v3822_v30  ;;  %v4060_v43 = vcombine.high %v394_v36, %v398_v37  ;;  %v386_v44 = vld [vmem:[#allocation3 + $0x880] sm:$0xff]  ;;  %v4059_v48 = vcombine.low %v394_v36, %v398_v37  ;;  %v3885_v37 = vcombine.low %v219_v25, %v223_v27  ;;  %v4571_v16 = vld [vmem:[%s4682_s0 + $0x10] ss:$24 sps:$4 sm:$0xff]  }
  0x83   :  { %v390_v56 = vld [vmem:[#allocation3 + $0x8a0] sm:$0xff]  ;;  %v291_v18 = vld [vmem:[#allocation3 + $0x588] sm:$0xff] }
  0x84   :  { %2539 = vmatpush1.bf16.msra.mxu0 %v4075_v33  ;;  %v4052_v50 = vcombine.high %v386_v44, %v390_v56  ;;  %v378_v51 = vld [vmem:[#allocation3 + $0x840] sm:$0xff]  ;;  %v4051_v57 = vcombine.low %v386_v44, %v390_v56  ;;  %v211_v33 = vld [vmem:[#allocation3 + $0x308] sm:$0xff] }
  0x85   :  { %2582 = vmatpush1.bf16.msra.mxu1 %v3821_v34  ;;  %2540 = vmatprep.subr.bf16.mxu0 %v4068_v35  ;;  %v382_v52 = vld [vmem:[#allocation3 + $0x860] sm:$0xff]  ;;  %v3886_v34 = vcombine.high %v219_v25, %v223_v27  ;;  %v215_v35 = vld [vmem:[#allocation3 + $0x328] sm:$0xff] }
  0x86   :  { %2583 = vmatprep.subr.bf16.mxu1 %v3814_v39  ;;  %v4044_v60 = vcombine.high %v378_v51, %v382_v52  ;;  %v370_v61 = vld [vmem:[#allocation3 + $0x800] sm:$0xff]  ;;  %v4043_v2 = vcombine.low %v378_v51, %v382_v52  ;;  %v3877_v56 = vcombine.low %v211_v33, %v215_v35  ;;  %v283_v27 = vld [vmem:[#allocation3 + $0x548] sm:$0xff] }
  0x87   :  { %v374_v62 = vld [vmem:[#allocation3 + $0x820] sm:$0xff] }
  0x88   :  { %2541 = vmatpush1.bf16.msra.mxu0 %v4067_v41  ;;  %v4036_v4 = vcombine.high %v370_v61, %v374_v62  ;;  %v490_v5 = vld [vmem:[#allocation3 + $0xbc0] sm:$0xff]  ;;  %v4035_v10 = vcombine.low %v370_v61, %v374_v62  ;;  %v203_v41 = vld [vmem:[#allocation3 + $0x2c8] sm:$0xff] }
  0x89   :  { %2584 = vmatpush1.bf16.msra.mxu1 %v3813_v42  ;;  %2542 = vmatprep.subr.bf16.mxu0 %v4060_v43  ;;  %v494_v6 = vld [vmem:[#allocation3 + $0xbe0] sm:$0xff]  ;;  %v3878_v42 = vcombine.high %v211_v33, %v215_v35  ;;  %v207_v43 = vld [vmem:[#allocation3 + $0x2e8] sm:$0xff] }
  0x8a   :  { %2585 = vmatprep.subr.bf16.mxu1 %v3806_v46  ;;  %v4156_v13 = vcombine.high %v490_v5, %v494_v6  ;;  %v482_v14 = vld [vmem:[#allocation3 + $0xb80] sm:$0xff]  ;;  %v4155_v19 = vcombine.low %v490_v5, %v494_v6  ;;  %v3869_v52 = vcombine.low %v203_v41, %v207_v43 }
  0x8b   :  { %v486_v15 = vld [vmem:[#allocation3 + $0xba0] sm:$0xff] }
  0x8c   :  { %2543 = vmatpush1.bf16.msra.mxu0 %v4059_v48  ;;  %v4148_v21 = vcombine.high %v482_v14, %v486_v15  ;;  %v474_v23 = vld [vmem:[#allocation3 + $0xb40] sm:$0xff]  ;;  %v4147_v28 = vcombine.low %v482_v14, %v486_v15  ;;  %v195_v48 = vld [vmem:[#allocation3 + $0x288] sm:$0xff] }
  0x8d   :  { %2586 = vmatpush1.bf16.msra.mxu1 %v3805_v49  ;;  %2544 = vmatprep.subr.bf16.mxu0 %v4052_v50  ;;  %v478_v24 = vld [vmem:[#allocation3 + $0xb60] sm:$0xff]  ;;  %v3870_v49 = vcombine.high %v203_v41, %v207_v43  ;;  %v199_v50 = vld [vmem:[#allocation3 + $0x2a8] sm:$0xff] }
  0x8e   :  { %2587 = vmatprep.subr.bf16.mxu1 %v3798_v54  ;;  %v4140_v30 = vcombine.high %v474_v23, %v478_v24  ;;  %v466_v31 = vld [vmem:[#allocation3 + $0xb00] sm:$0xff]  ;;  %v4139_v36 = vcombine.low %v474_v23, %v478_v24  ;;  %v3861_v62 = vcombine.low %v195_v48, %v199_v50  ;;  %v423_v23 = vld [vmem:[#allocation3 + $0x9a8] sm:$0xff] }
  0x8f   :  { %v470_v32 = vld [vmem:[#allocation3 + $0xb20] sm:$0xff]  ;;  %v267_v43 = vld [vmem:[#allocation3 + $0x4c8] sm:$0xff] }
  0x90   :  { %2545 = vmatpush1.bf16.msra.mxu0 %v4051_v57  ;;  %v4132_v38 = vcombine.high %v466_v31, %v470_v32  ;;  %v458_v39 = vld [vmem:[#allocation3 + $0xac0] sm:$0xff]  ;;  %v4131_v44 = vcombine.low %v466_v31, %v470_v32  ;;  %v187_v57 = vld [vmem:[#allocation3 + $0x248] sm:$0xff] }
  0x91   :  { %2588 = vmatpush1.bf16.msra.mxu1 %v3797_v58  ;;  %2546 = vmatprep.subr.bf16.mxu0 %v4044_v60  ;;  %v462_v40 = vld [vmem:[#allocation3 + $0xae0] sm:$0xff]  ;;  %v3862_v58 = vcombine.high %v195_v48, %v199_v50  ;;  %v191_v60 = vld [vmem:[#allocation3 + $0x268] sm:$0xff] }
  0x92   :  { %2589 = vmatprep.subr.bf16.mxu1 %v3790_v0  ;;  %v4124_v45 = vcombine.high %v458_v39, %v462_v40  ;;  %v450_v46 = vld [vmem:[#allocation3 + $0xa80] sm:$0xff]  ;;  %v4123_v51 = vcombine.low %v458_v39, %v462_v40  ;;  %v3853_v6 = vcombine.low %v187_v57, %v191_v60  ;;  %v415_v31 = vld [vmem:[#allocation3 + $0x968] sm:$0xff] }
  0x93   :  { %v454_v47 = vld [vmem:[#allocation3 + $0xaa0] sm:$0xff]  ;;  %v407_v39 = vld [vmem:[#allocation3 + $0x928] sm:$0xff] }
  0x94   :  { %2547 = vmatpush1.bf16.msra.mxu0 %v4043_v2  ;;  %v4116_v53 = vcombine.high %v450_v46, %v454_v47  ;;  %v442_v54 = vld [vmem:[#allocation3 + $0xa40] sm:$0xff]  ;;  %v4115_v61 = vcombine.low %v450_v46, %v454_v47  ;;  %v179_v2 = vld [vmem:[#allocation3 + $0x208] sm:$0xff] }
  0x95   :  { %2590 = vmatpush1.bf16.msra.mxu1 %v3789_v3  ;;  %2548 = vmatprep.subr.bf16.mxu0 %v4036_v4  ;;  %v446_v55 = vld [vmem:[#allocation3 + $0xa60] sm:$0xff]  ;;  %v3854_v3 = vcombine.high %v187_v57, %v191_v60  ;;  %v183_v4 = vld [vmem:[#allocation3 + $0x228] sm:$0xff] }
  0x96   :  { %2591 = vmatprep.subr.bf16.mxu1 %v3782_v8  ;;  %v4108_v63 = vcombine.high %v442_v54, %v446_v55  ;;  %v434_v0 = vld [vmem:[#allocation3 + $0xa00] sm:$0xff]  ;;  %v4107_v5 = vcombine.low %v442_v54, %v446_v55  ;;  %v299_v8 = vld [vmem:[#allocation3 + $0x5c8] sm:$0xff]  ;;  %v3845_v15 = vcombine.low %v179_v2, %v183_v4 }
  0x97   :  { %v438_v1 = vld [vmem:[#allocation3 + $0xa20] sm:$0xff]  ;;  %v3965_v24 = vcombine.low %v299_v8, %v303_v9  ;;  %v259_v48 = vld [vmem:[#allocation3 + $0x488] sm:$0xff] }
  0x98   :  { %2549 = vmatpush1.bf16.msra.mxu0 %v4035_v10  ;;  %v4100_v7 = vcombine.high %v434_v0, %v438_v1  ;;  %v427_v10 = vld [vmem:[#allocation3 + $0x9c8] sm:$0xff]  ;;  %v4099_v14 = vcombine.low %v434_v0, %v438_v1 }
  0x99   :  { %2592 = vmatpush1.bf16.msra.mxu1 %v3781_v11  ;;  %2550 = vmatprep.subr.bf16.mxu0 %v4156_v13  ;;  %v3846_v11 = vcombine.high %v179_v2, %v183_v4  ;;  %v431_v13 = vld [vmem:[#allocation3 + $0x9e8] sm:$0xff] }
  0x9a   :  { %2593 = vmatprep.subr.bf16.mxu1 %v3902_v17  ;;  %v3966_v17 = vcombine.high %v299_v8, %v303_v9  ;;  %v4093_v25 = vcombine.low %v427_v10, %v431_v13  ;;  %v387_v50 = vld [vmem:[#allocation3 + $0x888] sm:$0xff] }
  0x9b   :  { %v251_v57 = vld [vmem:[#allocation3 + $0x448] sm:$0xff] }
  0x9c   :  { %2551 = vmatpush2.bf16.msra.mxu0 %v4155_v19  ;;  %v295_v19 = vld [vmem:[#allocation3 + $0x5a8] sm:$0xff] }
  0x9d   :  { %2594 = vmatpush2.bf16.msra.mxu1 %v3901_v20  ;;  %2552 = vmatprep.subr.bf16.mxu0 %v4148_v21  ;;  %v419_v20 = vld [vmem:[#allocation3 + $0x988] sm:$0xff]  ;;  %v4094_v21 = vcombine.high %v427_v10, %v431_v13  ;;  %v3957_v32 = vcombine.low %v291_v18, %v295_v19 }
  0x9e   :  { %2595 = vmatprep.subr.bf16.mxu1 %v3894_v26  ;;  %v3958_v26 = vcombine.high %v291_v18, %v295_v19  ;;  %v4085_v33 = vcombine.low %v419_v20, %v423_v23  ;;  %v379_v60 = vld [vmem:[#allocation3 + $0x848] sm:$0xff] }
  0x9f   :  { %v243_v2 = vld [vmem:[#allocation3 + $0x408] sm:$0xff] }
  0xa0   :  { %2553 = vmatpush2.bf16.msra.mxu0 %v4147_v28  ;;  %v287_v28 = vld [vmem:[#allocation3 + $0x568] sm:$0xff] }
  0xa1   :  { %2596 = vmatpush2.bf16.msra.mxu1 %v3893_v29  ;;  %2554 = vmatprep.subr.bf16.mxu0 %v4140_v30  ;;  %v411_v29 = vld [vmem:[#allocation3 + $0x948] sm:$0xff]  ;;  %v4086_v30 = vcombine.high %v419_v20, %v423_v23  ;;  %v3949_v40 = vcombine.low %v283_v27, %v287_v28 }
  0xa2   :  { %2597 = vmatprep.subr.bf16.mxu1 %v3886_v34  ;;  %v3950_v34 = vcombine.high %v283_v27, %v287_v28  ;;  %v4078_v35 = vcombine.high %v411_v29, %v415_v31  ;;  %v371_v4 = vld [vmem:[#allocation3 + $0x808] sm:$0xff] }
  0xa3   :  { %v363_v10 = vld [vmem:[#allocation3 + $0x7c8] sm:$0xff] }
  0xa4   :  { %2555 = vmatpush2.bf16.msra.mxu0 %v4139_v36  ;;  %v275_v36 = vld [vmem:[#allocation3 + $0x508] sm:$0xff] }
  0xa5   :  { %2598 = vmatpush2.bf16.msra.mxu1 %v3885_v37  ;;  %2556 = vmatprep.subr.bf16.mxu0 %v4132_v38  ;;  %v279_v37 = vld [vmem:[#allocation3 + $0x528] sm:$0xff] }
  0xa6   :  { %2599 = vmatprep.subr.bf16.mxu1 %v3878_v42  ;;  %v403_v38 = vld [vmem:[#allocation3 + $0x908] sm:$0xff]  ;;  %v3942_v41 = vcombine.high %v275_v36, %v279_v37  ;;  %v3941_v46 = vcombine.low %v275_v36, %v279_v37 }
  0xa7   :  { %v4070_v42 = vcombine.high %v403_v38, %v407_v39  ;;  %v491_v13 = vld [vmem:[#allocation3 + $0xbc8] sm:$0xff] }
  0xa8   :  { %2557 = vmatpush2.bf16.msra.mxu0 %v4131_v44  ;;  %v271_v44 = vld [vmem:[#allocation3 + $0x4e8] sm:$0xff] }
  0xa9   :  { %2600 = vmatpush2.bf16.msra.mxu1 %v3877_v56  ;;  %2558 = vmatprep.subr.bf16.mxu0 %v4124_v45  ;;  %v395_v56 = vld [vmem:[#allocation3 + $0x8c8] sm:$0xff]  ;;  %v3934_v47 = vcombine.high %v267_v43, %v271_v44 }
  0xaa   :  { %2601 = vmatprep.subr.bf16.mxu1 %v3870_v49  ;;  %v399_v45 = vld [vmem:[#allocation3 + $0x8e8] sm:$0xff] }
  0xab   :  { %v263_v49 = vld [vmem:[#allocation3 + $0x4a8] sm:$0xff] }
  0xac   :  { %2559 = vmatpush2.bf16.msra.mxu0 %v4123_v51  ;;  %v391_v51 = vld [vmem:[#allocation3 + $0x8a8] sm:$0xff]  ;;  %v3926_v54 = vcombine.high %v259_v48, %v263_v49 }
  0xad   :  { %2602 = vmatpush2.bf16.msra.mxu1 %v3869_v52  ;;  %2560 = vmatprep.subr.bf16.mxu0 %v4116_v53  ;;  %v3933_v52 = vcombine.low %v267_v43, %v271_v44  ;;  %v4061_v53 = vcombine.low %v395_v56, %v399_v45  ;;  %v4054_v55 = vcombine.high %v387_v50, %v391_v51  ;;  %v355_v20 = vld [vmem:[#allocation3 + $0x788] sm:$0xff] }
  0xae   :  { %2603 = vmatprep.subr.bf16.mxu1 %v3862_v58  ;;  %v255_v58 = vld [vmem:[#allocation3 + $0x468] sm:$0xff] }
  0xaf   :  { %v3918_v0 = vcombine.high %v251_v57, %v255_v58  ;;  %v483_v23 = vld [vmem:[#allocation3 + $0xb88] sm:$0xff] }
  0xb0   :  { %2561 = vmatpush2.bf16.msra.mxu0 %v4115_v61  ;;  %v383_v61 = vld [vmem:[#allocation3 + $0x868] sm:$0xff] }
  0xb1   :  { %2604 = vmatpush2.bf16.msra.mxu1 %v3861_v62  ;;  %2562 = vmatprep.subr.bf16.mxu0 %v4108_v63  ;;  %v3925_v62 = vcombine.low %v259_v48, %v263_v49  ;;  %v4053_v63 = vcombine.low %v387_v50, %v391_v51  ;;  %v4046_v1 = vcombine.high %v379_v60, %v383_v61  ;;  %v339_v37 = vld [vmem:[#allocation3 + $0x708] sm:$0xff] }
  0xb2   :  { %2605 = vmatprep.subr.bf16.mxu1 %v3854_v3  ;;  %v247_v3 = vld [vmem:[#allocation3 + $0x428] sm:$0xff] }
  0xb3   :  { %v3910_v8 = vcombine.high %v243_v2, %v247_v3  ;;  %v331_v44 = vld [vmem:[#allocation3 + $0x6c8] sm:$0xff] }
  0xb4   :  { %2563 = vmatpush2.bf16.msra.mxu0 %v4107_v5  ;;  %v375_v5 = vld [vmem:[#allocation3 + $0x828] sm:$0xff] }
  0xb5   :  { %2606 = vmatpush2.bf16.msra.mxu1 %v3853_v6  ;;  %2564 = vmatprep.subr.bf16.mxu0 %v4100_v7  ;;  %v3917_v6 = vcombine.low %v251_v57, %v255_v58  ;;  %v4045_v7 = vcombine.low %v379_v60, %v383_v61  ;;  %v4038_v9 = vcombine.high %v371_v4, %v375_v5  ;;  %v323_v49 = vld [vmem:[#allocation3 + $0x688] sm:$0xff] }
  0xb6   :  { %2607 = vmatprep.subr.bf16.mxu1 %v3846_v11  ;;  %v367_v11 = vld [vmem:[#allocation3 + $0x7e8] sm:$0xff] }
  0xb7   :  { %v4030_v18 = vcombine.high %v363_v10, %v367_v11  ;;  %v327_v50 = vld [vmem:[#allocation3 + $0x6a8] sm:$0xff] }
  0xb8   :  { %2565 = vmatpush2.bf16.msra.mxu0 %v4099_v14  ;;  %v495_v14 = vld [vmem:[#allocation3 + $0xbe8] sm:$0xff] }
  0xb9   :  { %2608 = vmatpush2.bf16.msra.mxu1 %v3845_v15  ;;  %2620 = vmatprep.subr.bf16.mxu0 %v3966_v17  ;;  %v3909_v15 = vcombine.low %v243_v2, %v247_v3  ;;  %v4037_v17 = vcombine.low %v371_v4, %v375_v5  ;;  %v4158_v19 = vcombine.high %v491_v13, %v495_v14  ;;  %v451_v51 = vld [vmem:[#allocation3 + $0xa88] sm:$0xff] }
  0xba   :  { %2663 = vmatprep.subr.bf16.mxu1 %v4094_v21  ;;  %v359_v21 = vld [vmem:[#allocation3 + $0x7a8] sm:$0xff] }
  0xbb   :  { %2567 = vmatmul.mubr.bf16.vlgmr.msra.gmra.mxu0 %v4571_v16  ;;  %v4022_v27 = vcombine.high %v355_v20, %v359_v21  ;;  %v315_v58 = vld [vmem:[#allocation3 + $0x648] sm:$0xff] }
  0xbc   :  { %2610 = vmatmul.mubr.bf16.vlgmr.msra.gmra.mxu1 %v4555_v12  ;;  %2621 = vmatpush1.bf16.msra.mxu0 %v3965_v24  ;;  %v4077_v12 = vcombine.low %v411_v29, %v415_v31  ;;  %v487_v24 = vld [vmem:[#allocation3 + $0xba8] sm:$0xff] }
  0xbd   :  { %2664 = vmatpush1.bf16.msra.mxu1 %v4093_v25  ;;  %2622 = vmatprep.subr.bf16.mxu0 %v3958_v26  ;;  %v4029_v25 = vcombine.low %v363_v10, %v367_v11  ;;  %v4157_v26 = vcombine.low %v491_v13, %v495_v14  ;;  %v4150_v28 = vcombine.high %v483_v23, %v487_v24  ;;  %v347_v29 = vld [vmem:[#allocation3 + $0x748] sm:$0xff]  ;;  %v172_v11 = vld [vmem:[#allocation3 + $0x1d0] sm:$0xff] }
  0xbe   :  { %2665 = vmatprep.subr.bf16.mxu1 %v4086_v30  ;;  %2652 = vmatprep.mubr.bf16.mxu0 %v4548_v59  ;;  %v4069_v59 = vcombine.low %v403_v38, %v407_v39  ;;  %v351_v30 = vld [vmem:[#allocation3 + $0x768] sm:$0xff]  ;;  %v176_v13 = vld [vmem:[#allocation3 + $0x1f0] sm:$0xff] }
  0xbf   :  { %2695 = vmatprep.mubr.bf16.mxu1 %v4563_v22  ;;  %v4062_v22 = vcombine.high %v395_v56, %v399_v45  ;;  %v475_v31 = vld [vmem:[#allocation3 + $0xb48] sm:$0xff]  ;;  %v300_v14 = vld [vmem:[#allocation3 + $0x5d0] sm:$0xff] }
  0xc0   :  { %2623 = vmatpush1.bf16.msra.mxu0 %v3957_v32  ;;  %v479_v32 = vld [vmem:[#allocation3 + $0xb68] sm:$0xff] }
  0xc1   :  { %2666 = vmatpush1.bf16.msra.mxu1 %v4085_v33  ;;  %2624 = vmatprep.subr.bf16.mxu0 %v3950_v34  ;;  %v4021_v33 = vcombine.low %v355_v20, %v359_v21  ;;  %v4149_v34 = vcombine.low %v483_v23, %v487_v24  ;;  %v4142_v36 = vcombine.high %v475_v31, %v479_v32  ;;  %v343_v38 = vld [vmem:[#allocation3 + $0x728] sm:$0xff]  ;;  %v164_v21 = vld [vmem:[#allocation3 + $0x190] sm:$0xff] }
  0xc2   :  { %2667 = vmatprep.subr.bf16.mxu1 %v4078_v35  ;;  %v4014_v35 = vcombine.high %v347_v29, %v351_v30  ;;  %v467_v39 = vld [vmem:[#allocation3 + $0xb08] sm:$0xff]  ;;  %v168_v23 = vld [vmem:[#allocation3 + $0x1b0] sm:$0xff] }
  0xc3   :  { %v335_v56 = vld [vmem:[#allocation3 + $0x6e8] sm:$0xff]  ;;  %v292_v24 = vld [vmem:[#allocation3 + $0x590] sm:$0xff] }
  0xc4   :  { %2625 = vmatpush1.bf16.msra.mxu0 %v3949_v40  ;;  %v471_v40 = vld [vmem:[#allocation3 + $0xb28] sm:$0xff] }
  0xc5   :  { %2668 = vmatpush1.bf16.msra.mxu1 %v4077_v12  ;;  %2626 = vmatprep.subr.bf16.mxu0 %v3942_v41  ;;  %v4013_v12 = vcombine.low %v347_v29, %v351_v30  ;;  %v4141_v41 = vcombine.low %v475_v31, %v479_v32  ;;  %v4134_v43 = vcombine.high %v467_v39, %v471_v40  ;;  %v459_v45 = vld [vmem:[#allocation3 + $0xac8] sm:$0xff]  ;;  %v156_v30 = vld [vmem:[#allocation3 + $0x150] sm:$0xff] }
  0xc6   :  { %2669 = vmatprep.subr.bf16.mxu1 %v4070_v42  ;;  %v4006_v42 = vcombine.high %v339_v37, %v343_v38  ;;  %v319_v60 = vld [vmem:[#allocation3 + $0x668] sm:$0xff]  ;;  %v160_v31 = vld [vmem:[#allocation3 + $0x170] sm:$0xff] }
  0xc7   :  { %v443_v61 = vld [vmem:[#allocation3 + $0xa48] sm:$0xff] }
  0xc8   :  { %2627 = vmatpush1.bf16.msra.mxu0 %v3941_v46  ;;  %v463_v46 = vld [vmem:[#allocation3 + $0xae8] sm:$0xff] }
  0xc9   :  { %2670 = vmatpush1.bf16.msra.mxu1 %v4069_v59  ;;  %2628 = vmatprep.subr.bf16.mxu0 %v3934_v47  ;;  %v4005_v59 = vcombine.low %v339_v37, %v343_v38  ;;  %v4133_v47 = vcombine.low %v467_v39, %v471_v40  ;;  %v4126_v48 = vcombine.high %v459_v45, %v463_v46  ;;  %v307_v3 = vld [vmem:[#allocation3 + $0x608] sm:$0xff]  ;;  %v148_v39 = vld [vmem:[#allocation3 + $0x110] sm:$0xff] }
  0xca   :  { %2671 = vmatprep.subr.bf16.mxu1 %v4062_v22  ;;  %v3998_v22 = vcombine.high %v331_v44, %v335_v56  ;;  %v311_v4 = vld [vmem:[#allocation3 + $0x628] sm:$0xff]  ;;  %v3824_v37 = vcombine.high %v156_v30, %v160_v31  ;;  %v152_v40 = vld [vmem:[#allocation3 + $0x130] sm:$0xff] }
  0xcb   :  { %v435_v5 = vld [vmem:[#allocation3 + $0xa08] sm:$0xff] }
  0xcc   :  { %2629 = vmatpush1.bf16.msra.mxu0 %v3933_v52  ;;  %v455_v52 = vld [vmem:[#allocation3 + $0xaa8] sm:$0xff] }
  0xcd   :  { %2672 = vmatpush1.bf16.msra.mxu1 %v4061_v53  ;;  %2630 = vmatprep.subr.bf16.mxu0 %v3926_v54  ;;  %v3997_v53 = vcombine.low %v331_v44, %v335_v56  ;;  %v4125_v54 = vcombine.low %v459_v45, %v463_v46  ;;  %v4118_v57 = vcombine.high %v451_v51, %v455_v52  ;;  %v4580_v32 = vld [vmem:[%s4682_s0 + $0x8] ss:$24 sps:$4 sm:$0xff]   ;;  %v140_v46 = vld [vmem:[#allocation3 + $0xd0] sm:$0xff] }
  0xce   :  { %2673 = vmatprep.subr.bf16.mxu1 %v4054_v55  ;;  %v3990_v55 = vcombine.high %v323_v49, %v327_v50  ;;  %v3816_v56 = vcombine.high %v148_v39, %v152_v40 }
  0xd0   :  { %2631 = vmatpush1.bf16.msra.mxu0 %v3925_v62  ;;  %v447_v62 = vld [vmem:[#allocation3 + $0xa68] sm:$0xff] }
  0xd1   :  { %2674 = vmatpush1.bf16.msra.mxu1 %v4053_v63  ;;  %2632 = vmatprep.subr.bf16.mxu0 %v3918_v0  ;;  %v3989_v63 = vcombine.low %v323_v49, %v327_v50  ;;  %v4117_v0 = vcombine.low %v451_v51, %v455_v52  ;;  %v4110_v2 = vcombine.high %v443_v61, %v447_v62  ;;  %v132_v52 = vld [vmem:[#allocation3 + $0x90] sm:$0xff] }
  0xd2   :  { %2675 = vmatprep.subr.bf16.mxu1 %v4046_v1  ;;  %v3982_v1 = vcombine.high %v315_v58, %v319_v60 }
  0xd4   :  { %2633 = vmatpush1.bf16.msra.mxu0 %v3917_v6  ;;  %v439_v6 = vld [vmem:[#allocation3 + $0xa28] sm:$0xff] }
  0xd5   :  { %2676 = vmatpush1.bf16.msra.mxu1 %v4045_v7  ;;  %2634 = vmatprep.subr.bf16.mxu0 %v3910_v8  ;;  %v3981_v7 = vcombine.low %v315_v58, %v319_v60  ;;  %v4109_v8 = vcombine.low %v443_v61, %v447_v62  ;;  %v4102_v10 = vcombine.high %v435_v5, %v439_v6  ;;  %v124_v62 = vld [vmem:[#allocation3 + $0x50] sm:$0xff] }
  0xd6   :  { %2677 = vmatprep.subr.bf16.mxu1 %v4038_v9  ;;  %v3974_v9 = vcombine.high %v307_v3, %v311_v4 }
  0xd8   :  { %2635 = vmatpush1.bf16.msra.mxu0 %v3909_v15  ;;  %v304_v15 = vld [vmem:[#allocation3 + $0x5f0] sm:$0xff] }
  0xd9   :  { %2678 = vmatpush1.bf16.msra.mxu1 %v4037_v17  ;;  %2636 = vmatprep.subr.bf16.mxu0 %v4030_v18  ;;  %v3973_v17 = vcombine.low %v307_v3, %v311_v4  ;;  %v4101_v18 = vcombine.low %v435_v5, %v439_v6  ;;  %v3968_v20 = vcombine.high %v300_v14, %v304_v15  ;;  %v116_v6 = vld [vmem:[#allocation3 + $0x10] sm:$0xff] }
  0xda   :  { %2679 = vmatprep.subr.bf16.mxu1 %v4158_v19  ;;  %v3840_v19 = vcombine.high %v172_v11, %v176_v13 }
  0xdc   :  { %2637 = vmatpush2.bf16.msra.mxu0 %v4029_v25  ;;  %v296_v25 = vld [vmem:[#allocation3 + $0x5b0] sm:$0xff] }
  0xdd   :  { %2680 = vmatpush2.bf16.msra.mxu1 %v4157_v26  ;;  %2638 = vmatprep.subr.bf16.mxu0 %v4022_v27  ;;  %v3839_v26 = vcombine.low %v172_v11, %v176_v13  ;;  %v3967_v27 = vcombine.low %v300_v14, %v304_v15  ;;  %v3960_v29 = vcombine.high %v292_v24, %v296_v25  ;;  %v236_v15 = vld [vmem:[#allocation3 + $0x3d0] sm:$0xff] }
  0xde   :  { %2681 = vmatprep.subr.bf16.mxu1 %v4150_v28  ;;  %v3832_v28 = vcombine.high %v164_v21, %v168_v23 }
  0xe0   :  { %2639 = vmatpush2.bf16.msra.mxu0 %v4021_v33  ;;  %v284_v33 = vld [vmem:[#allocation3 + $0x550] sm:$0xff] }
  0xe1   :  { %2682 = vmatpush2.bf16.msra.mxu1 %v4149_v34  ;;  %2640 = vmatprep.subr.bf16.mxu0 %v4014_v35  ;;  %v288_v34 = vld [vmem:[#allocation3 + $0x570] sm:$0xff]  ;;  %v3831_v35 = vcombine.low %v164_v21, %v168_v23 }
  0xe2   :  { %2683 = vmatprep.subr.bf16.mxu1 %v4142_v36  ;;  %v3959_v36 = vcombine.low %v292_v24, %v296_v25  ;;  %v3952_v38 = vcombine.high %v284_v33, %v288_v34  ;;  %v3951_v44 = vcombine.low %v284_v33, %v288_v34  ;;  %v228_v25 = vld [vmem:[#allocation3 + $0x390] sm:$0xff] }
  0xe3   :  { %v220_v34 = vld [vmem:[#allocation3 + $0x350] sm:$0xff] }
  0xe4   :  { %2641 = vmatpush2.bf16.msra.mxu0 %v4013_v12  ;;  %v4587_v12 = vld [vmem:[%s4682_s0 + $0x4] ss:$24 sps:$4 sm:$0xff]  }
  0xe5   :  { %2684 = vmatpush2.bf16.msra.mxu1 %v4141_v41  ;;  %2642 = vmatprep.subr.bf16.mxu0 %v4006_v42  ;;  %v276_v41 = vld [vmem:[#allocation3 + $0x510] sm:$0xff] }
  0xe6   :  { %2685 = vmatprep.subr.bf16.mxu1 %v4134_v43  ;;  %v280_v42 = vld [vmem:[#allocation3 + $0x530] sm:$0xff]  ;;  %v3823_v43 = vcombine.low %v156_v30, %v160_v31 }
  0xe7   :  { %v3944_v45 = vcombine.high %v276_v41, %v280_v42  ;;  %v3943_v49 = vcombine.low %v276_v41, %v280_v42  ;;  %v212_v42 = vld [vmem:[#allocation3 + $0x310] sm:$0xff] }
  0xe8   :  { %2643 = vmatpush2.bf16.msra.mxu0 %v4005_v59  ;;  %v144_v59 = vld [vmem:[#allocation3 + $0xf0] sm:$0xff] }
  0xe9   :  { %2686 = vmatpush2.bf16.msra.mxu1 %v4133_v47  ;;  %2644 = vmatprep.subr.bf16.mxu0 %v3998_v22  ;;  %v268_v47 = vld [vmem:[#allocation3 + $0x4d0] sm:$0xff]  ;;  %v3808_v50 = vcombine.high %v140_v46, %v144_v59 }
  0xea   :  { %2687 = vmatprep.subr.bf16.mxu1 %v4126_v48  ;;  %v272_v22 = vld [vmem:[#allocation3 + $0x4f0] sm:$0xff]  ;;  %v3815_v48 = vcombine.low %v148_v39, %v152_v40 }
  0xeb   :  { %v3936_v51 = vcombine.high %v268_v47, %v272_v22  ;;  %v3935_v58 = vcombine.low %v268_v47, %v272_v22  ;;  %v204_v22 = vld [vmem:[#allocation3 + $0x2d0] sm:$0xff] }
  0xec   :  { %2645 = vmatpush2.bf16.msra.mxu0 %v3997_v53  ;;  %v136_v53 = vld [vmem:[#allocation3 + $0xb0] sm:$0xff] }
  0xed   :  { %2688 = vmatpush2.bf16.msra.mxu1 %v4125_v54  ;;  %2646 = vmatprep.subr.bf16.mxu0 %v3990_v55  ;;  %v260_v54 = vld [vmem:[#allocation3 + $0x490] sm:$0xff]  ;;  %v3800_v60 = vcombine.high %v132_v52, %v136_v53 }
  0xee   :  { %2689 = vmatprep.subr.bf16.mxu1 %v4118_v57  ;;  %v264_v55 = vld [vmem:[#allocation3 + $0x4b0] sm:$0xff]  ;;  %v3807_v57 = vcombine.low %v140_v46, %v144_v59 }
  0xef   :  { %v3928_v61 = vcombine.high %v260_v54, %v264_v55  ;;  %v3927_v3 = vcombine.low %v260_v54, %v264_v55  ;;  %v196_v55 = vld [vmem:[#allocation3 + $0x290] sm:$0xff] }
  0xf0   :  { %2647 = vmatpush2.bf16.msra.mxu0 %v3989_v63  ;;  %v128_v63 = vld [vmem:[#allocation3 + $0x70] sm:$0xff] }
  0xf1   :  { %2690 = vmatpush2.bf16.msra.mxu1 %v4117_v0  ;;  %2648 = vmatprep.subr.bf16.mxu0 %v3982_v1  ;;  %v252_v0 = vld [vmem:[#allocation3 + $0x450] sm:$0xff]  ;;  %v3792_v4 = vcombine.high %v124_v62, %v128_v63 }
  0xf2   :  { %2691 = vmatprep.subr.bf16.mxu1 %v4110_v2  ;;  %v256_v1 = vld [vmem:[#allocation3 + $0x470] sm:$0xff]  ;;  %v3799_v2 = vcombine.low %v132_v52, %v136_v53 }
  0xf3   :  { %v3920_v5 = vcombine.high %v252_v0, %v256_v1  ;;  %v3919_v11 = vcombine.low %v252_v0, %v256_v1  ;;  %v188_v1 = vld [vmem:[#allocation3 + $0x250] sm:$0xff] }
  0xf4   :  { %2649 = vmatpush2.bf16.msra.mxu0 %v3981_v7  ;;  %v120_v7 = vld [vmem:[#allocation3 + $0x30] sm:$0xff] }
  0xf5   :  { %2692 = vmatpush2.bf16.msra.mxu1 %v4109_v8  ;;  %2650 = vmatprep.subr.bf16.mxu0 %v3974_v9  ;;  %v244_v8 = vld [vmem:[#allocation3 + $0x410] sm:$0xff]  ;;  %v3784_v13 = vcombine.high %v116_v6, %v120_v7 }
  0xf6   :  { %2693 = vmatprep.subr.bf16.mxu1 %v4102_v10  ;;  %v248_v9 = vld [vmem:[#allocation3 + $0x430] sm:$0xff]  ;;  %v3791_v10 = vcombine.low %v124_v62, %v128_v63 }
  0xf7   :  { %v3912_v14 = vcombine.high %v244_v8, %v248_v9  ;;  %v3911_v21 = vcombine.low %v244_v8, %v248_v9  ;;  %v180_v9 = vld [vmem:[#allocation3 + $0x210] sm:$0xff] }
  0xf8   :  { %2651 = vmatpush2.bf16.msra.mxu0 %v3973_v17  ;;  %v240_v17 = vld [vmem:[#allocation3 + $0x3f0] sm:$0xff] }
  0xf9   :  { %2694 = vmatpush2.bf16.msra.mxu1 %v4101_v18  ;;  %2706 = vmatprep.subr.bf16.mxu0 %v3840_v19  ;;  %v364_v18 = vld [vmem:[#allocation3 + $0x7d0] sm:$0xff]  ;;  %v3904_v23 = vcombine.high %v236_v15, %v240_v17 }
  0xfa   :  { %2749 = vmatprep.subr.bf16.mxu1 %v3968_v20  ;;  %v368_v19 = vld [vmem:[#allocation3 + $0x7f0] sm:$0xff]  ;;  %v3783_v20 = vcombine.low %v116_v6, %v120_v7 }
  0xfb   :  { %2653 = vmatmul.mubr.bf16.vlgmr.msra.gmra.mxu0 %v4580_v32  ;;  %v4032_v24 = vcombine.high %v364_v18, %v368_v19  ;;  %v4031_v30 = vcombine.low %v364_v18, %v368_v19  ;;  %v428_v19 = vld [vmem:[#allocation3 + $0x9d0] sm:$0xff] }
  0xfc   :  { %2696 = vmatmul.mubr.bf16.vlgmr.msra.gmra.mxu1 %v4571_v16  ;;  %2707 = vmatpush1.bf16.msra.mxu0 %v3839_v26  ;;  %v4593_v16 = vld [vmem:[%s4682_s0 + $0xc] ss:$24 sps:$4 sm:$0xff]   ;;  %v232_v26 = vld [vmem:[#allocation3 + $0x3b0] sm:$0xff] }
  0xfd   :  { %2750 = vmatpush1.bf16.msra.mxu1 %v3967_v27  ;;  %2708 = vmatprep.subr.bf16.mxu0 %v3832_v28  ;;  %v356_v27 = vld [vmem:[#allocation3 + $0x790] sm:$0xff]  ;;  %v3896_v31 = vcombine.high %v228_v25, %v232_v26 }
  0xfe   :  { %2751 = vmatprep.subr.bf16.mxu1 %v3960_v29  ;;  %2738 = vmatprep.mubr.bf16.mxu0 %v4587_v12  ;;  %v360_v28 = vld [vmem:[#allocation3 + $0x7b0] sm:$0xff]  ;;  %v3903_v29 = vcombine.low %v236_v15, %v240_v17 }
  0xff   :  { %2781 = vmatprep.mubr.bf16.mxu1 %v4593_v16  ;;  %v4024_v33 = vcombine.high %v356_v27, %v360_v28  ;;  %v4023_v39 = vcombine.low %v356_v27, %v360_v28  ;;  %v420_v28 = vld [vmem:[#allocation3 + $0x990] sm:$0xff] }
 0x100   :  { %2709 = vmatpush1.bf16.msra.mxu0 %v3831_v35  ;;  %v224_v35 = vld [vmem:[#allocation3 + $0x370] sm:$0xff] }
 0x101   :  { %2752 = vmatpush1.bf16.msra.mxu1 %v3959_v36  ;;  %2710 = vmatprep.subr.bf16.mxu0 %v3824_v37  ;;  %v348_v36 = vld [vmem:[#allocation3 + $0x750] sm:$0xff]  ;;  %v3888_v40 = vcombine.high %v220_v34, %v224_v35 }
 0x102   :  { %2753 = vmatprep.subr.bf16.mxu1 %v3952_v38  ;;  %v352_v37 = vld [vmem:[#allocation3 + $0x770] sm:$0xff]  ;;  %v3895_v38 = vcombine.low %v228_v25, %v232_v26 }
 0x103   :  { %v4016_v41 = vcombine.high %v348_v36, %v352_v37  ;;  %v4015_v46 = vcombine.low %v348_v36, %v352_v37  ;;  %v412_v37 = vld [vmem:[#allocation3 + $0x950] sm:$0xff] }
 0x104   :  { %2711 = vmatpush1.bf16.msra.mxu0 %v3823_v43  ;;  %v216_v43 = vld [vmem:[#allocation3 + $0x330] sm:$0xff] }
 0x105   :  { %2754 = vmatpush1.bf16.msra.mxu1 %v3951_v44  ;;  %2712 = vmatprep.subr.bf16.mxu0 %v3816_v56  ;;  %v340_v44 = vld [vmem:[#allocation3 + $0x710] sm:$0xff]  ;;  %v3880_v59 = vcombine.high %v212_v42, %v216_v43 }
 0x106   :  { %2755 = vmatprep.subr.bf16.mxu1 %v3944_v45  ;;  %v344_v56 = vld [vmem:[#allocation3 + $0x730] sm:$0xff]  ;;  %v3887_v45 = vcombine.low %v220_v34, %v224_v35 }
 0x107   :  { %v4008_v47 = vcombine.high %v340_v44, %v344_v56  ;;  %v4007_v52 = vcombine.low %v340_v44, %v344_v56 }
 0x108   :  { %2713 = vmatpush1.bf16.msra.mxu0 %v3815_v48  ;;  %v208_v48 = vld [vmem:[#allocation3 + $0x2f0] sm:$0xff] }
 0x109   :  { %2756 = vmatpush1.bf16.msra.mxu1 %v3943_v49  ;;  %2714 = vmatprep.subr.bf16.mxu0 %v3808_v50  ;;  %v332_v49 = vld [vmem:[#allocation3 + $0x6d0] sm:$0xff]  ;;  %v3872_v53 = vcombine.high %v204_v22, %v208_v48 }
 0x10a   :  { %2757 = vmatprep.subr.bf16.mxu1 %v3936_v51  ;;  %v336_v50 = vld [vmem:[#allocation3 + $0x6f0] sm:$0xff]  ;;  %v3879_v51 = vcombine.low %v212_v42, %v216_v43 }
 0x10b   :  { %v4000_v54 = vcombine.high %v332_v49, %v336_v50  ;;  %v3999_v62 = vcombine.low %v332_v49, %v336_v50 }
 0x10c   :  { %2715 = vmatpush1.bf16.msra.mxu0 %v3807_v57  ;;  %v200_v57 = vld [vmem:[#allocation3 + $0x2b0] sm:$0xff] }
 0x10d   :  { %2758 = vmatpush1.bf16.msra.mxu1 %v3935_v58  ;;  %2716 = vmatprep.subr.bf16.mxu0 %v3800_v60  ;;  %v324_v58 = vld [vmem:[#allocation3 + $0x690] sm:$0xff]  ;;  %v3864_v63 = vcombine.high %v196_v55, %v200_v57 }
 0x10e   :  { %2759 = vmatprep.subr.bf16.mxu1 %v3928_v61  ;;  %v328_v60 = vld [vmem:[#allocation3 + $0x6b0] sm:$0xff]  ;;  %v3871_v61 = vcombine.low %v204_v22, %v208_v48  ;;  %v153_v22 = vld [vmem:[#allocation3 + $0x138] sm:$0xff] }
 0x10f   :  { %v3992_v0 = vcombine.high %v324_v58, %v328_v60  ;;  %v3991_v6 = vcombine.low %v324_v58, %v328_v60  ;;  %v388_v60 = vld [vmem:[#allocation3 + $0x890] sm:$0xff] }
 0x110   :  { %2717 = vmatpush1.bf16.msra.mxu0 %v3799_v2  ;;  %v192_v2 = vld [vmem:[#allocation3 + $0x270] sm:$0xff] }
 0x111   :  { %2760 = vmatpush1.bf16.msra.mxu1 %v3927_v3  ;;  %2718 = vmatprep.subr.bf16.mxu0 %v3792_v4  ;;  %v316_v3 = vld [vmem:[#allocation3 + $0x650] sm:$0xff]  ;;  %v3856_v7 = vcombine.high %v188_v1, %v192_v2 }
 0x112   :  { %2761 = vmatprep.subr.bf16.mxu1 %v3920_v5  ;;  %v320_v4 = vld [vmem:[#allocation3 + $0x670] sm:$0xff]  ;;  %v3863_v5 = vcombine.low %v196_v55, %v200_v57 }
 0x113   :  { %v3984_v8 = vcombine.high %v316_v3, %v320_v4  ;;  %v3983_v15 = vcombine.low %v316_v3, %v320_v4  ;;  %v380_v4 = vld [vmem:[#allocation3 + $0x850] sm:$0xff] }
 0x114   :  { %2719 = vmatpush1.bf16.msra.mxu0 %v3791_v10  ;;  %v184_v10 = vld [vmem:[#allocation3 + $0x230] sm:$0xff] }
 0x115   :  { %2762 = vmatpush1.bf16.msra.mxu1 %v3919_v11  ;;  %2720 = vmatprep.subr.bf16.mxu0 %v3784_v13  ;;  %v308_v11 = vld [vmem:[#allocation3 + $0x610] sm:$0xff]  ;;  %v3848_v17 = vcombine.high %v180_v9, %v184_v10 }
 0x116   :  { %2763 = vmatprep.subr.bf16.mxu1 %v3912_v14  ;;  %v312_v13 = vld [vmem:[#allocation3 + $0x630] sm:$0xff]  ;;  %v3855_v14 = vcombine.low %v188_v1, %v192_v2 }
 0x117   :  { %v3976_v18 = vcombine.high %v308_v11, %v312_v13  ;;  %v3975_v25 = vcombine.low %v308_v11, %v312_v13  ;;  %v372_v13 = vld [vmem:[#allocation3 + $0x810] sm:$0xff] }
 0x118   :  { %2721 = vmatpush1.bf16.msra.mxu0 %v3783_v20  ;;  %v432_v20 = vld [vmem:[#allocation3 + $0x9f0] sm:$0xff] }
 0x119   :  { %2764 = vmatpush1.bf16.msra.mxu1 %v3911_v21  ;;  %2722 = vmatprep.subr.bf16.mxu0 %v3904_v23  ;;  %v173_v21 = vld [vmem:[#allocation3 + $0x1d8] sm:$0xff]  ;;  %v4096_v26 = vcombine.high %v428_v19, %v432_v20 }
 0x11a   :  { %2765 = vmatprep.subr.bf16.mxu1 %v4032_v24  ;;  %v177_v23 = vld [vmem:[#allocation3 + $0x1f8] sm:$0xff]  ;;  %v3847_v24 = vcombine.low %v180_v9, %v184_v10 }
 0x11b   :  { %v3842_v27 = vcombine.high %v173_v21, %v177_v23  ;;  %v3841_v34 = vcombine.low %v173_v21, %v177_v23  ;;  %v492_v23 = vld [vmem:[#allocation3 + $0xbd0] sm:$0xff] }
 0x11c   :  { %2723 = vmatpush2.bf16.msra.mxu0 %v3903_v29  ;;  %v424_v29 = vld [vmem:[#allocation3 + $0x9b0] sm:$0xff] }
 0x11d   :  { %2766 = vmatpush2.bf16.msra.mxu1 %v4031_v30  ;;  %2724 = vmatprep.subr.bf16.mxu0 %v3896_v31  ;;  %v165_v30 = vld [vmem:[#allocation3 + $0x198] sm:$0xff]  ;;  %v4088_v35 = vcombine.high %v420_v28, %v424_v29  ;;  %v4087_v42 = vcombine.low %v420_v28, %v424_v29 }
 0x11e   :  { %2767 = vmatprep.subr.bf16.mxu1 %v4024_v33  ;;  %v169_v31 = vld [vmem:[#allocation3 + $0x1b8] sm:$0xff]  ;;  %v4095_v33 = vcombine.low %v428_v19, %v432_v20 }
 0x11f   :  { %v3834_v36 = vcombine.high %v165_v30, %v169_v31  ;;  %v3833_v43 = vcombine.low %v165_v30, %v169_v31  ;;  %v484_v31 = vld [vmem:[#allocation3 + $0xb90] sm:$0xff] }
 0x120   :  { %2725 = vmatpush2.bf16.msra.mxu0 %v3895_v38  ;;  %v416_v38 = vld [vmem:[#allocation3 + $0x970] sm:$0xff] }
 0x121   :  { %2768 = vmatpush2.bf16.msra.mxu1 %v4023_v39  ;;  %2726 = vmatprep.subr.bf16.mxu0 %v3888_v40  ;;  %v4599_v39 = vld [vmem:[%s4682_s0] ss:$24 sps:$4 sm:$0xff]   ;;  %v4080_v44 = vcombine.high %v412_v37, %v416_v38 }
 0x122   :  { %2769 = vmatprep.subr.bf16.mxu1 %v4016_v41  ;;  %v157_v40 = vld [vmem:[#allocation3 + $0x158] sm:$0xff] }
 0x123   :  { %v161_v41 = vld [vmem:[#allocation3 + $0x178] sm:$0xff] }
 0x124   :  { %2727 = vmatpush2.bf16.msra.mxu0 %v3887_v45  ;;  %v3826_v56 = vcombine.high %v157_v40, %v161_v41  ;;  %v404_v45 = vld [vmem:[#allocation3 + $0x910] sm:$0xff]  ;;  %v3825_v48 = vcombine.low %v157_v40, %v161_v41 }
 0x125   :  { %2770 = vmatpush2.bf16.msra.mxu1 %v4015_v46  ;;  %2728 = vmatprep.subr.bf16.mxu0 %v3880_v59  ;;  %v408_v46 = vld [vmem:[#allocation3 + $0x930] sm:$0xff] }
 0x126   :  { %2771 = vmatprep.subr.bf16.mxu1 %v4008_v47  ;;  %v4606_v59 = vld [vmem:[%s4682_s0 + $0x14] ss:$24 sps:$4 sm:$0xff]   ;;  %v149_v47 = vld [vmem:[#allocation3 + $0x118] sm:$0xff]  ;;  %v4072_v49 = vcombine.high %v404_v45, %v408_v46  ;;  %v4071_v55 = vcombine.low %v404_v45, %v408_v46 }
 0x127   :  { %v3818_v50 = vcombine.high %v149_v47, %v153_v22  ;;  %v3817_v57 = vcombine.low %v149_v47, %v153_v22  ;;  %v476_v41 = vld [vmem:[#allocation3 + $0xb50] sm:$0xff] }
 0x128   :  { %2729 = vmatpush2.bf16.msra.mxu0 %v3879_v51  ;;  %v396_v51 = vld [vmem:[#allocation3 + $0x8d0] sm:$0xff] }
 0x129   :  { %2772 = vmatpush2.bf16.msra.mxu1 %v4007_v52  ;;  %2730 = vmatprep.subr.bf16.mxu0 %v3872_v53  ;;  %v400_v52 = vld [vmem:[#allocation3 + $0x8f0] sm:$0xff]  ;;  %v141_v53 = vld [vmem:[#allocation3 + $0xd8] sm:$0xff] }
 0x12a   :  { %2773 = vmatprep.subr.bf16.mxu1 %v4000_v54  ;;  %v145_v54 = vld [vmem:[#allocation3 + $0xf8] sm:$0xff]  ;;  %v4064_v58 = vcombine.high %v396_v51, %v400_v52  ;;  %v468_v22 = vld [vmem:[#allocation3 + $0xb10] sm:$0xff] }
 0x12b   :  { %v3809_v1 = vcombine.low %v141_v53, %v145_v54 }
 0x12c   :  { %2731 = vmatpush2.bf16.msra.mxu0 %v3871_v61  ;;  %v392_v61 = vld [vmem:[#allocation3 + $0x8b0] sm:$0xff] }
 0x12d   :  { %2774 = vmatpush2.bf16.msra.mxu1 %v3999_v62  ;;  %2732 = vmatprep.subr.bf16.mxu0 %v3864_v63  ;;  %v133_v62 = vld [vmem:[#allocation3 + $0x98] sm:$0xff]  ;;  %v4056_v2 = vcombine.high %v388_v60, %v392_v61 }
 0x12e   :  { %2775 = vmatprep.subr.bf16.mxu1 %v3992_v0  ;;  %v137_v63 = vld [vmem:[#allocation3 + $0xb8] sm:$0xff]  ;;  %v4063_v0 = vcombine.low %v396_v51, %v400_v52 }
 0x12f   :  { %v3802_v3 = vcombine.high %v133_v62, %v137_v63  ;;  %v3801_v9 = vcombine.low %v133_v62, %v137_v63  ;;  %v452_v63 = vld [vmem:[#allocation3 + $0xa90] sm:$0xff] }
 0x130   :  { %2733 = vmatpush2.bf16.msra.mxu0 %v3863_v5  ;;  %v384_v5 = vld [vmem:[#allocation3 + $0x870] sm:$0xff] }
 0x131   :  { %2776 = vmatpush2.bf16.msra.mxu1 %v3991_v6  ;;  %2734 = vmatprep.subr.bf16.mxu0 %v3856_v7  ;;  %v125_v6 = vld [vmem:[#allocation3 + $0x58] sm:$0xff]  ;;  %v4048_v10 = vcombine.high %v380_v4, %v384_v5 }
 0x132   :  { %2777 = vmatprep.subr.bf16.mxu1 %v3984_v8  ;;  %v129_v7 = vld [vmem:[#allocation3 + $0x78] sm:$0xff]  ;;  %v4055_v8 = vcombine.low %v388_v60, %v392_v61 }
 0x133   :  { %v3794_v11 = vcombine.high %v125_v6, %v129_v7  ;;  %v3793_v19 = vcombine.low %v125_v6, %v129_v7  ;;  %v444_v7 = vld [vmem:[#allocation3 + $0xa50] sm:$0xff] }
 0x134   :  { %2735 = vmatpush2.bf16.msra.mxu0 %v3855_v14  ;;  %v376_v14 = vld [vmem:[#allocation3 + $0x830] sm:$0xff] }
 0x135   :  { %2778 = vmatpush2.bf16.msra.mxu1 %v3983_v15  ;;  %2736 = vmatprep.subr.bf16.mxu0 %v3848_v17  ;;  %v117_v15 = vld [vmem:[#allocation3 + $0x18] sm:$0xff]  ;;  %v4040_v20 = vcombine.high %v372_v13, %v376_v14 }
 0x136   :  { %2779 = vmatprep.subr.bf16.mxu1 %v3976_v18  ;;  %v121_v17 = vld [vmem:[#allocation3 + $0x38] sm:$0xff]  ;;  %v4047_v18 = vcombine.low %v380_v4, %v384_v5 }
 0x137   :  { %v3786_v21 = vcombine.high %v117_v15, %v121_v17  ;;  %v3785_v28 = vcombine.low %v117_v15, %v121_v17  ;;  %v436_v17 = vld [vmem:[#allocation3 + $0xa10] sm:$0xff] }
 0x138   :  { %2737 = vmatpush2.bf16.msra.mxu0 %v3847_v24  ;;  %v496_v24 = vld [vmem:[#allocation3 + $0xbf0] sm:$0xff] }
 0x139   :  { %2780 = vmatpush2.bf16.msra.mxu1 %v3975_v25  ;;  %2792 = vmatprep.subr.bf16.mxu0 %v4096_v26  ;;  %v237_v25 = vld [vmem:[#allocation3 + $0x3d8] sm:$0xff]  ;;  %v4160_v29 = vcombine.high %v492_v23, %v496_v24 }
 0x13a   :  { %2835 = vmatprep.subr.bf16.mxu1 %v3842_v27  ;;  %v241_v26 = vld [vmem:[#allocation3 + $0x3f8] sm:$0xff]  ;;  %v4039_v27 = vcombine.low %v372_v13, %v376_v14 }
 0x13b   :  { %2739 = vmatmul.mubr.bf16.vlgmr.msra.gmra.mxu0 %v4599_v39  ;;  %v3906_v30 = vcombine.high %v237_v25, %v241_v26 }
 0x13c   :  { %2782 = vmatmul.mubr.bf16.vlgmr.msra.gmra.mxu1 %v4580_v32  ;;  %2793 = vmatpush1.bf16.msra.mxu0 %v4095_v33  ;;  %v4079_v32 = vcombine.low %v412_v37, %v416_v38  ;;  %v488_v33 = vld [vmem:[#allocation3 + $0xbb0] sm:$0xff]  ;;  %v3905_v37 = vcombine.low %v237_v25, %v241_v26  ;;  %v301_v26 = vld [vmem:[#allocation3 + $0x5d8] sm:$0xff] }
 0x13d   :  { %2836 = vmatpush1.bf16.msra.mxu1 %v3841_v34  ;;  %2794 = vmatprep.subr.bf16.mxu0 %v4088_v35  ;;  %v229_v34 = vld [vmem:[#allocation3 + $0x398] sm:$0xff]  ;;  %v4152_v38 = vcombine.high %v484_v31, %v488_v33 }
 0x13e   :  { %2837 = vmatprep.subr.bf16.mxu1 %v3834_v36  ;;  %2824 = vmatprep.mubr.bf16.mxu0 %v4606_v59  ;;  %v233_v35 = vld [vmem:[#allocation3 + $0x3b8] sm:$0xff]  ;;  %v4159_v36 = vcombine.low %v492_v23, %v496_v24 }
 0x13f   :  { %2867 = vmatprep.mubr.bf16.mxu1 %v4587_v12  ;;  %v3810_v12 = vcombine.high %v141_v53, %v145_v54  ;;  %v3898_v40 = vcombine.high %v229_v34, %v233_v35  ;;  %v3897_v45 = vcombine.low %v229_v34, %v233_v35  ;;  %v460_v54 = vld [vmem:[#allocation3 + $0xad0] sm:$0xff]  ;;  %v293_v35 = vld [vmem:[#allocation3 + $0x598] sm:$0xff] }
 0x140   :  { %2795 = vmatpush1.bf16.msra.mxu0 %v4087_v42  ;;  %v480_v42 = vld [vmem:[#allocation3 + $0xb70] sm:$0xff] }
 0x141   :  { %2838 = vmatpush1.bf16.msra.mxu1 %v3833_v43  ;;  %2796 = vmatprep.subr.bf16.mxu0 %v4080_v44  ;;  %v221_v43 = vld [vmem:[#allocation3 + $0x358] sm:$0xff]  ;;  %v4144_v46 = vcombine.high %v476_v41, %v480_v42 }
 0x142   :  { %2839 = vmatprep.subr.bf16.mxu1 %v3826_v56  ;;  %v225_v44 = vld [vmem:[#allocation3 + $0x378] sm:$0xff]  ;;  %v4151_v56 = vcombine.low %v484_v31, %v488_v33 }
 0x143   :  { %v3890_v47 = vcombine.high %v221_v43, %v225_v44  ;;  %v3889_v51 = vcombine.low %v221_v43, %v225_v44  ;;  %v285_v44 = vld [vmem:[#allocation3 + $0x558] sm:$0xff] }
 0x144   :  { %2797 = vmatpush1.bf16.msra.mxu0 %v4079_v32  ;;  %v472_v32 = vld [vmem:[#allocation3 + $0xb30] sm:$0xff] }
 0x145   :  { %2840 = vmatpush1.bf16.msra.mxu1 %v3825_v48  ;;  %2798 = vmatprep.subr.bf16.mxu0 %v4072_v49  ;;  %v213_v48 = vld [vmem:[#allocation3 + $0x318] sm:$0xff]  ;;  %v4136_v52 = vcombine.high %v468_v22, %v472_v32 }
 0x146   :  { %2841 = vmatprep.subr.bf16.mxu1 %v3818_v50  ;;  %v217_v49 = vld [vmem:[#allocation3 + $0x338] sm:$0xff]  ;;  %v4143_v50 = vcombine.low %v476_v41, %v480_v42 }
 0x147   :  { %v3882_v53 = vcombine.high %v213_v48, %v217_v49  ;;  %v3881_v60 = vcombine.low %v213_v48, %v217_v49 }
 0x148   :  { %2799 = vmatpush1.bf16.msra.mxu0 %v4071_v55  ;;  %v464_v55 = vld [vmem:[#allocation3 + $0xaf0] sm:$0xff] }
 0x149   :  { %2842 = vmatpush1.bf16.msra.mxu1 %v3817_v57  ;;  %2800 = vmatprep.subr.bf16.mxu0 %v4064_v58  ;;  %v205_v57 = vld [vmem:[#allocation3 + $0x2d8] sm:$0xff]  ;;  %v4128_v61 = vcombine.high %v460_v54, %v464_v55 }
 0x14a   :  { %2843 = vmatprep.subr.bf16.mxu1 %v3810_v12  ;;  %v209_v58 = vld [vmem:[#allocation3 + $0x2f8] sm:$0xff]  ;;  %v4135_v12 = vcombine.low %v468_v22, %v472_v32 }
 0x14b   :  { %v3874_v62 = vcombine.high %v205_v57, %v209_v58  ;;  %v3873_v4 = vcombine.low %v205_v57, %v209_v58  ;;  %v269_v58 = vld [vmem:[#allocation3 + $0x4d8] sm:$0xff] }
 0x14c   :  { %2801 = vmatpush1.bf16.msra.mxu0 %v4063_v0  ;;  %v456_v0 = vld [vmem:[#allocation3 + $0xab0] sm:$0xff] }
 0x14d   :  { %2844 = vmatpush1.bf16.msra.mxu1 %v3809_v1  ;;  %2802 = vmatprep.subr.bf16.mxu0 %v4056_v2  ;;  %v197_v1 = vld [vmem:[#allocation3 + $0x298] sm:$0xff]  ;;  %v4120_v5 = vcombine.high %v452_v63, %v456_v0 }
 0x14e   :  { %2845 = vmatprep.subr.bf16.mxu1 %v3802_v3  ;;  %v201_v2 = vld [vmem:[#allocation3 + $0x2b8] sm:$0xff]  ;;  %v4127_v3 = vcombine.low %v460_v54, %v464_v55 }
 0x14f   :  { %v3866_v6 = vcombine.high %v197_v1, %v201_v2  ;;  %v3865_v13 = vcombine.low %v197_v1, %v201_v2  ;;  %v265_v1 = vld [vmem:[#allocation3 + $0x4b8] sm:$0xff] }
 0x150   :  { %2803 = vmatpush1.bf16.msra.mxu0 %v4055_v8  ;;  %v448_v8 = vld [vmem:[#allocation3 + $0xa70] sm:$0xff]  ;;  %v389_v2 = vld [vmem:[#allocation3 + $0x898] sm:$0xff] }
 0x151   :  { %2846 = vmatpush1.bf16.msra.mxu1 %v3801_v9  ;;  %2804 = vmatprep.subr.bf16.mxu0 %v4048_v10  ;;  %v189_v9 = vld [vmem:[#allocation3 + $0x258] sm:$0xff]  ;;  %v4112_v14 = vcombine.high %v444_v7, %v448_v8 }
 0x152   :  { %2847 = vmatprep.subr.bf16.mxu1 %v3794_v11  ;;  %v193_v10 = vld [vmem:[#allocation3 + $0x278] sm:$0xff]  ;;  %v4119_v11 = vcombine.low %v452_v63, %v456_v0 }
 0x153   :  { %v3858_v15 = vcombine.high %v189_v9, %v193_v10  ;;  %v3857_v23 = vcombine.low %v189_v9, %v193_v10  ;;  %v261_v0 = vld [vmem:[#allocation3 + $0x498] sm:$0xff] }
 0x154   :  { %2805 = vmatpush1.bf16.msra.mxu0 %v4047_v18  ;;  %v440_v18 = vld [vmem:[#allocation3 + $0xa30] sm:$0xff]  ;;  %v257_v9 = vld [vmem:[#allocation3 + $0x478] sm:$0xff] }
 0x155   :  { %2848 = vmatpush1.bf16.msra.mxu1 %v3793_v19  ;;  %2806 = vmatprep.subr.bf16.mxu0 %v4040_v20  ;;  %v181_v19 = vld [vmem:[#allocation3 + $0x218] sm:$0xff]  ;;  %v4104_v24 = vcombine.high %v436_v17, %v440_v18 }
 0x156   :  { %2849 = vmatprep.subr.bf16.mxu1 %v3786_v21  ;;  %v185_v20 = vld [vmem:[#allocation3 + $0x238] sm:$0xff]  ;;  %v4111_v21 = vcombine.low %v444_v7, %v448_v8 }
 0x157   :  { %v3850_v25 = vcombine.high %v181_v19, %v185_v20  ;;  %v3849_v31 = vcombine.low %v181_v19, %v185_v20  ;;  %v253_v8 = vld [vmem:[#allocation3 + $0x458] sm:$0xff] }
 0x158   :  { %2807 = vmatpush1.bf16.msra.mxu0 %v4039_v27  ;;  %v305_v27 = vld [vmem:[#allocation3 + $0x5f8] sm:$0xff] }
 0x159   :  { %2850 = vmatpush1.bf16.msra.mxu1 %v3785_v28  ;;  %2808 = vmatprep.subr.bf16.mxu0 %v4160_v29  ;;  %v429_v28 = vld [vmem:[#allocation3 + $0x9d8] sm:$0xff]  ;;  %v3970_v33 = vcombine.high %v301_v26, %v305_v27 }
 0x15a   :  { %2851 = vmatprep.subr.bf16.mxu1 %v3906_v30  ;;  %v433_v29 = vld [vmem:[#allocation3 + $0x9f8] sm:$0xff]  ;;  %v4103_v30 = vcombine.low %v436_v17, %v440_v18 }
 0x15b   :  { %v4098_v34 = vcombine.high %v429_v28, %v433_v29  ;;  %v4097_v41 = vcombine.low %v429_v28, %v433_v29  ;;  %v381_v10 = vld [vmem:[#allocation3 + $0x858] sm:$0xff] }
 0x15c   :  { %2809 = vmatpush2.bf16.msra.mxu0 %v4159_v36  ;;  %v297_v36 = vld [vmem:[#allocation3 + $0x5b8] sm:$0xff] }
 0x15d   :  { %2852 = vmatpush2.bf16.msra.mxu1 %v3905_v37  ;;  %2810 = vmatprep.subr.bf16.mxu0 %v4152_v38  ;;  %v421_v37 = vld [vmem:[#allocation3 + $0x998] sm:$0xff]  ;;  %v3962_v42 = vcombine.high %v293_v35, %v297_v36  ;;  %v3961_v22 = vcombine.low %v293_v35, %v297_v36  ;;  %v4619_v35 = vpop.f32.mrf.mxu0 }
 0x15e   :  { %2853 = vmatprep.subr.bf16.mxu1 %v3898_v40  ;;  %v425_v38 = vld [vmem:[#allocation3 + $0x9b8] sm:$0xff]  ;;  %v3969_v40 = vcombine.low %v301_v26, %v305_v27 }
 0x15f   :  { %v4090_v43 = vcombine.high %v421_v37, %v425_v38  ;;  %v4089_v32 = vcombine.low %v421_v37, %v425_v38  ;;  %v245_v18 = vld [vmem:[#allocation3 + $0x418] sm:$0xff] }
 0x160   :  { %2811 = vmatpush2.bf16.msra.mxu0 %v4151_v56  ;;  %v289_v56 = vld [vmem:[#allocation3 + $0x578] sm:$0xff] }
 0x161   :  { %2854 = vmatpush2.bf16.msra.mxu1 %v3897_v45  ;;  %2812 = vmatprep.subr.bf16.mxu0 %v4144_v46  ;;  %v4613_v45 = vld [vmem:[%s4682_s0 + $0x10] ss:$24 sps:$4 sm:$0xff]   ;;  %v413_v46 = vld [vmem:[#allocation3 + $0x958] sm:$0xff]  ;;  %v3954_v48 = vcombine.high %v285_v44, %v289_v56  ;;  %v3953_v54 = vcombine.low %v285_v44, %v289_v56  ;;  %v4621_v56 = vpop.f32.mrf.mxu0 }
 0x162   :  { %2855 = vmatprep.subr.bf16.mxu1 %v3890_v47  ;;  %v417_v47 = vld [vmem:[#allocation3 + $0x978] sm:$0xff] }
 0x163   :  { %v4082_v49 = vcombine.high %v413_v46, %v417_v47  ;;  %v249_v19 = vld [vmem:[#allocation3 + $0x438] sm:$0xff] }
 0x164   :  { %2813 = vmatpush2.bf16.msra.mxu0 %v4143_v50  ;;  %v277_v50 = vld [vmem:[#allocation3 + $0x518] sm:$0xff] }
 0x165   :  { %2856 = vmatpush2.bf16.msra.mxu1 %v3889_v51  ;;  %2814 = vmatprep.subr.bf16.mxu0 %v4136_v52  ;;  %v281_v51 = vld [vmem:[#allocation3 + $0x538] sm:$0xff] }
 0x166   :  { %2857 = vmatprep.subr.bf16.mxu1 %v3882_v53  ;;  %v405_v52 = vld [vmem:[#allocation3 + $0x918] sm:$0xff]  ;;  %v3946_v55 = vcombine.high %v277_v50, %v281_v51 }
 0x167   :  { %v409_v53 = vld [vmem:[#allocation3 + $0x938] sm:$0xff] }
 0x168   :  { %2815 = vmatpush2.bf16.msra.mxu0 %v4135_v12  ;;  %v4074_v57 = vcombine.high %v405_v52, %v409_v53  ;;  %v273_v12 = vld [vmem:[#allocation3 + $0x4f8] sm:$0xff] }
 0x169   :  { %2858 = vmatpush2.bf16.msra.mxu1 %v3881_v60  ;;  %2816 = vmatprep.subr.bf16.mxu0 %v4128_v61  ;;  %v397_v60 = vld [vmem:[#allocation3 + $0x8d8] sm:$0xff]  ;;  %v3938_v63 = vcombine.high %v269_v58, %v273_v12 }
 0x16a   :  { %2859 = vmatprep.subr.bf16.mxu1 %v3874_v62  ;;  %v401_v61 = vld [vmem:[#allocation3 + $0x8f8] sm:$0xff]  ;;  %v3945_v62 = vcombine.low %v277_v50, %v281_v51 }
 0x16b   :  { %v373_v20 = vld [vmem:[#allocation3 + $0x818] sm:$0xff] }
 0x16c   :  { %2817 = vmatpush2.bf16.msra.mxu0 %v4127_v3  ;;  %v393_v3 = vld [vmem:[#allocation3 + $0x8b8] sm:$0xff] }
 0x16d   :  { %2860 = vmatpush2.bf16.msra.mxu1 %v3873_v4  ;;  %2818 = vmatprep.subr.bf16.mxu0 %v4120_v5  ;;  %v3937_v4 = vcombine.low %v269_v58, %v273_v12  ;;  %v4065_v5 = vcombine.low %v397_v60, %v401_v61  ;;  %v4058_v7 = vcombine.high %v389_v2, %v393_v3  ;;  %v365_v27 = vld [vmem:[#allocation3 + $0x7d8] sm:$0xff]  ;;  %v4625_v58 = vpop.f32.mrf.mxu1 }
 0x16e   :  { %2861 = vmatprep.subr.bf16.mxu1 %v3866_v6  ;;  %v3930_v6 = vcombine.high %v261_v0, %v265_v1  ;;  %v369_v28 = vld [vmem:[#allocation3 + $0x7f8] sm:$0xff] }
 0x16f   :  { %v493_v29 = vld [vmem:[#allocation3 + $0xbd8] sm:$0xff] }
 0x170   :  { %2819 = vmatpush2.bf16.msra.mxu0 %v4119_v11  ;;  %v385_v11 = vld [vmem:[#allocation3 + $0x878] sm:$0xff] }
 0x171   :  { %2862 = vmatpush2.bf16.msra.mxu1 %v3865_v13  ;;  %2820 = vmatprep.subr.bf16.mxu0 %v4112_v14  ;;  %v3929_v13 = vcombine.low %v261_v0, %v265_v1  ;;  %v4057_v14 = vcombine.low %v389_v2, %v393_v3  ;;  %v4050_v17 = vcombine.high %v381_v10, %v385_v11  ;;  %v357_v37 = vld [vmem:[#allocation3 + $0x798] sm:$0xff]  ;;  %v2527_v2 = vpop.f32.mrf.mxu1 }
 0x172   :  { %2863 = vmatprep.subr.bf16.mxu1 %v3858_v15  ;;  %v3922_v15 = vcombine.high %v253_v8, %v257_v9  ;;  %v361_v38 = vld [vmem:[#allocation3 + $0x7b8] sm:$0xff] }
 0x173   :  { %v4026_v44 = vcombine.high %v357_v37, %v361_v38  ;;  %v461_v0 = vld [vmem:[#allocation3 + $0xad8] sm:$0xff] }
 0x174   :  { %2821 = vmatpush2.bf16.msra.mxu0 %v4111_v21  ;;  %v377_v21 = vld [vmem:[#allocation3 + $0x838] sm:$0xff] }
 0x175   :  { %2864 = vmatpush2.bf16.msra.mxu1 %v3857_v23  ;;  %2822 = vmatprep.subr.bf16.mxu0 %v4104_v24  ;;  %v3921_v23 = vcombine.low %v253_v8, %v257_v9  ;;  %v4049_v24 = vcombine.low %v381_v10, %v385_v11  ;;  %v4042_v26 = vcombine.high %v373_v20, %v377_v21  ;;  %v465_v1 = vld [vmem:[#allocation3 + $0xaf8] sm:$0xff] }
 0x176   :  { %2865 = vmatprep.subr.bf16.mxu1 %v3850_v25  ;;  %v3914_v25 = vcombine.high %v245_v18, %v249_v19  ;;  %v325_v8 = vld [vmem:[#allocation3 + $0x698] sm:$0xff] }
 0x177   :  { %v329_v9 = vld [vmem:[#allocation3 + $0x6b8] sm:$0xff] }
 0x178   :  { %2823 = vmatpush2.bf16.msra.mxu0 %v4103_v30  ;;  %v497_v30 = vld [vmem:[#allocation3 + $0xbf8] sm:$0xff] }
 0x179   :  { %2866 = vmatpush2.bf16.msra.mxu1 %v3849_v31  ;;  %2878 = vmatprep.subr.bf16.mxu0 %v3970_v33  ;;  %v3913_v31 = vcombine.low %v245_v18, %v249_v19  ;;  %v4041_v33 = vcombine.low %v373_v20, %v377_v21  ;;  %v4162_v36 = vcombine.high %v493_v29, %v497_v30  ;;  %v453_v10 = vld [vmem:[#allocation3 + $0xa98] sm:$0xff] }
 0x17a   :  { %2921 = vmatprep.subr.bf16.mxu1 %v4098_v34  ;;  %v4034_v34 = vcombine.high %v365_v27, %v369_v28  ;;  %v457_v11 = vld [vmem:[#allocation3 + $0xab8] sm:$0xff]  ;;  %v3994_v18 = vcombine.high %v325_v8, %v329_v9 }
 0x17b   :  { %2825 = vmatmul.mubr.bf16.vlgmr.msra.gmra.mxu0 %v4613_v45  ;;  %v4122_v19 = vcombine.high %v453_v10, %v457_v11  ;;  %v317_v20 = vld [vmem:[#allocation3 + $0x658] sm:$0xff] }
 0x17c   :  { %2868 = vmatmul.mubr.bf16.vlgmr.msra.gmra.mxu1 %v4599_v39  ;;  %2879 = vmatpush1.bf16.msra.mxu0 %v3969_v40  ;;  %v4081_v39 = vcombine.low %v413_v46, %v417_v47  ;;  %v485_v40 = vld [vmem:[#allocation3 + $0xb98] sm:$0xff] }
 0x17d   :  { %2922 = vmatpush1.bf16.msra.mxu1 %v4097_v41  ;;  %2880 = vmatprep.subr.bf16.mxu0 %v3962_v42  ;;  %v489_v41 = vld [vmem:[#allocation3 + $0xbb8] sm:$0xff]  ;;  %v4033_v42 = vcombine.low %v365_v27, %v369_v28  ;;  %v3993_v28 = vcombine.low %v325_v8, %v329_v9  ;;  %v4341_v8 = vld [vmem:[#allocation7 + $0x68] sm:$0xff]  }
 0x17e   :  { %2923 = vmatprep.subr.bf16.mxu1 %v4090_v43  ;;  %2910 = vmatprep.mubr.bf16.mxu0 %v4593_v16  ;;  %v4073_v16 = vcombine.low %v405_v52, %v409_v53  ;;  %v4161_v43 = vcombine.low %v493_v29, %v497_v30  ;;  %v4154_v46 = vcombine.high %v485_v40, %v489_v41  ;;  %v349_v47 = vld [vmem:[#allocation3 + $0x758] sm:$0xff]  ;;  %v4623_v52 = vpop.f32.mrf.mxu0 }
 0x17f   :  { %2953 = vmatprep.mubr.bf16.mxu1 %v4606_v59  ;;  %v4066_v59 = vcombine.high %v397_v60, %v401_v61  ;;  %v4153_v50 = vcombine.low %v485_v40, %v489_v41  ;;  %v321_v21 = vld [vmem:[#allocation3 + $0x678] sm:$0xff]  ;;  %v4121_v29 = vcombine.low %v453_v10, %v457_v11 }
 0x180   :  { %2881 = vmatpush1.bf16.msra.mxu0 %v3961_v22  ;;  %v353_v22 = vld [vmem:[#allocation3 + $0x778] sm:$0xff]  ;;  %v3986_v30 = vcombine.high %v317_v20, %v321_v21 }
 0x181   :  { %2924 = vmatpush1.bf16.msra.mxu1 %v4089_v32  ;;  %2882 = vmatprep.subr.bf16.mxu0 %v3954_v48  ;;  %v477_v32 = vld [vmem:[#allocation3 + $0xb58] sm:$0xff]  ;;  %v4018_v51 = vcombine.high %v349_v47, %v353_v22  ;;  %v4017_v12 = vcombine.low %v349_v47, %v353_v22 }
 0x182   :  { %2925 = vmatprep.subr.bf16.mxu1 %v4082_v49  ;;  %v481_v48 = vld [vmem:[#allocation3 + $0xb78] sm:$0xff]  ;;  %v4025_v49 = vcombine.low %v357_v37, %v361_v38 }
 0x183   :  { %v4146_v53 = vcombine.high %v477_v32, %v481_v48  ;;  %v4145_v60 = vcombine.low %v477_v32, %v481_v48  ;;  %v437_v38 = vld [vmem:[#allocation3 + $0xa18] sm:$0xff]  ;;  %v2528_v48 = vadd.f32 %v2527_v2, %v4621_v56 }
 0x184   :  { %2883 = vmatpush1.bf16.msra.mxu0 %v3953_v54  ;;  %v341_v54 = vld [vmem:[#allocation3 + $0x718] sm:$0xff] }
 0x185   :  { %2926 = vmatpush1.bf16.msra.mxu1 %v4081_v39  ;;  %2884 = vmatprep.subr.bf16.mxu0 %v3946_v55  ;;  %v345_v39 = vld [vmem:[#allocation3 + $0x738] sm:$0xff] }
 0x186   :  { %2927 = vmatprep.subr.bf16.mxu1 %v4074_v57  ;;  %v469_v55 = vld [vmem:[#allocation3 + $0xb18] sm:$0xff]  ;;  %v4010_v61 = vcombine.high %v341_v54, %v345_v39 }
 0x187   :  { %v473_v57 = vld [vmem:[#allocation3 + $0xb38] sm:$0xff] }
 0x188   :  { %2885 = vmatpush1.bf16.msra.mxu0 %v3945_v62  ;;  %v2488_v62 = vpop.f32.mrf.mxu0  ;;  %v441_v40 = vld [vmem:[#allocation3 + $0xa38] sm:$0xff] }
 0x189   :  { %2928 = vmatpush1.bf16.msra.mxu1 %v4073_v16  ;;  %2886 = vmatprep.subr.bf16.mxu0 %v3938_v63  ;;  %v4138_v16 = vcombine.high %v469_v55, %v473_v57  ;;  %v333_v63 = vld [vmem:[#allocation3 + $0x6d8] sm:$0xff]  ;;  %v4106_v32 = vcombine.high %v437_v38, %v441_v40 }
 0x18a   :  { %2929 = vmatprep.subr.bf16.mxu1 %v4066_v59  ;;  %v337_v59 = vld [vmem:[#allocation3 + $0x6f8] sm:$0xff]  ;;  %v4627_v3 = vpop.f32.mrf.mxu0 }
 0x18c   :  { %2887 = vmatpush1.bf16.msra.mxu0 %v3937_v4  ;;  %v4009_v4 = vcombine.low %v341_v54, %v345_v39  ;;  %v4105_v39 = vcombine.low %v437_v38, %v441_v40  ;;  %v4350_v38 = vld [vmem:[#allocation7 + $0xd8] sm:$0xff]  }
 0x18d   :  { %2930 = vmatpush1.bf16.msra.mxu1 %v4065_v5  ;;  %2888 = vmatprep.subr.bf16.mxu0 %v3930_v6  ;;  %v4137_v5 = vcombine.low %v469_v55, %v473_v57  ;;  %v4002_v6 = vcombine.high %v333_v63, %v337_v59  ;;  %v4333_v55 = vld [vmem:[#allocation7 + $0x78] sm:$0xff]  }
 0x18e   :  { %2931 = vmatprep.subr.bf16.mxu1 %v4058_v7  ;;  %v4130_v7 = vcombine.high %v461_v0, %v465_v1 }
 0x190   :  { %2889 = vmatpush1.bf16.msra.mxu0 %v3929_v13  ;;  %v4629_v13 = vpop.f32.mrf.mxu1 }
 0x191   :  { %2932 = vmatpush1.bf16.msra.mxu1 %v4057_v14  ;;  %2890 = vmatprep.subr.bf16.mxu0 %v3922_v15  ;;  %v2570_v14 = vpop.f32.mrf.mxu0  ;;  %v4001_v15 = vcombine.low %v333_v63, %v337_v59  ;;  %v4337_v63 = vld [vmem:[#allocation7 + $0x70] sm:$0xff]  }
 0x192   :  { %2933 = vmatprep.subr.bf16.mxu1 %v4050_v17  ;;  %v4129_v17 = vcombine.low %v461_v0, %v465_v1  ;;  %v4338_v59 = vld [vmem:[#allocation7 + $0xf0] sm:$0xff]   ;;  %v4403_v1 = vld [vmem:[%s4682_s0 + $0x8] ss:$24 sps:$4 sm:$0xff]  }
 0x193   :  { %v4631_v27 = vpop.f32.mrf.mxu0 }
 0x194   :  { %2891 = vmatpush1.bf16.msra.mxu0 %v3921_v23  ;;  %v3017_v23 = vlaneseq }
 0x195   :  { %2934 = vmatpush1.bf16.msra.mxu1 %v4049_v24  ;;  %2892 = vmatprep.subr.bf16.mxu0 %v3914_v25  ;;  %v445_v24 = vld [vmem:[#allocation3 + $0xa58] sm:$0xff]  ;;  %v2574_v41 = vpop.f32.mrf.mxu0 }
 0x196   :  { %2935 = vmatprep.subr.bf16.mxu1 %v4042_v26  ;;  %v449_v25 = vld [vmem:[#allocation3 + $0xa78] sm:$0xff]  ;;  %v2531_v26 = vpop.f32.mrf.mxu1  ;;  %v4635_v37 = vshrl.u32 %v3017_v23, 7 }
 0x198   :  { %2893 = vmatpush1.bf16.msra.mxu0 %v3913_v31  ;;  %v4633_v31 = vpop.f32.mrf.mxu1  ;;  %v3031_v11 = vsub.s32 3, %v4635_v37 }
 0x199   :  { %2936 = vmatpush1.bf16.msra.mxu1 %v4041_v33  ;;  %2894 = vmatprep.subr.bf16.mxu0 %v4034_v34  ;;  %v4114_v33 = vcombine.high %v445_v24, %v449_v25  ;;  %v309_v34 = vld [vmem:[#allocation3 + $0x618] sm:$0xff] }
 0x19a   :  { %2937 = vmatprep.subr.bf16.mxu1 %v4162_v36  ;;  %v313_v36 = vld [vmem:[#allocation3 + $0x638] sm:$0xff]  ;;  %v2613_v22 = vpop.f32.mrf.mxu1 }
 0x19b   :  { %v3978_v47 = vcombine.high %v309_v34, %v313_v36 }
 0x19c   :  { %2895 = vmatpush2.bf16.msra.mxu0 %v4033_v42  ;;  %v3985_v42 = vcombine.low %v317_v20, %v321_v21  ;;  %v4642_v57 = vpop.f32.mrf.mxu1  ;;  %v4345_v20 = vld [vmem:[#allocation7 + $0x60] sm:$0xff]  }
 0x19d   :  { %2938 = vmatpush2.bf16.msra.mxu1 %v4161_v43  ;;  %2896 = vmatprep.subr.bf16.mxu0 %v4026_v44  ;;  %v2532_v43 = vadd.f32 %v2531_v26, %v2488_v62  ;;  %v3023_v44 = vsub.s32 1, %v4635_v37  ;;  %v4336_v62 = vld [vmem:[#allocation7 + $0xb8] sm:$0xff]  }
 0x19e   :  { %2939 = vmatprep.subr.bf16.mxu1 %v4154_v46  ;;  %v4113_v46 = vcombine.low %v445_v24, %v449_v25  ;;  %v4346_v25 = vld [vmem:[#allocation7 + $0xe0] sm:$0xff]  }
 0x1a0   :  { %2897 = vmatpush2.bf16.msra.mxu0 %v4025_v49  ;;  %v2575_v49 = vadd.f32 %v2574_v41, %v2532_v43  ;;  %v4351_v41 = vld [vmem:[#allocation7 + $0x18] sm:$0xff]   ;;  %v4353_v43 = vld [vmem:[#allocation7 + $0x50] sm:$0xff]  }
 0x1a1   :  { %2940 = vmatpush2.bf16.msra.mxu1 %v4153_v50  ;;  %2898 = vmatprep.subr.bf16.mxu0 %v4018_v51  ;;  %v4639_v50 = vld [vmem:[#allocation5] sm:$0xff]  ;;  %v3977_v51 = vcombine.low %v309_v34, %v313_v36 }
 0x1a2   :  { %2941 = vmatprep.subr.bf16.mxu1 %v4146_v53  ;;  %v2571_v53 = vadd.f32 %v2570_v14, %v2528_v48  ;;  %v3024_v54 = vrot.slane %v4639_v50, %v3023_v44  ;;  %v4342_v14 = vld [vmem:[#allocation7 + $0xe8] sm:$0xff]   ;;  %v3032_v23 = vrot.slane %v4639_v50, %v3031_v11  ;;  %v4354_v44 = vld [vmem:[#allocation7 + $0xd0] sm:$0xff]  }
 0x1a3   :  { %v4358_v48 = vld [vmem:[#allocation7 + $0xc8] sm:$0xff]  }
 0x1a4   :  { %2899 = vmatpush2.bf16.msra.mxu0 %v4017_v12  ;;  %v4334_v12 = vld [vmem:[#allocation7 + $0xf8] sm:$0xff]   ;;  %v3058_v56 = vadd.f32 %v3024_v54, %v2571_v53  ;;  %v4385_v11 = vld [vmem:[#allocation7 + $0x1e8] sm:$0xff]  }
 0x1a5   :  { %2942 = vmatpush2.bf16.msra.mxu1 %v4145_v60  ;;  %2900 = vmatprep.subr.bf16.mxu0 %v4010_v61  ;;  %v3066_v60 = vadd.f32 %v3024_v54, %v2575_v49  ;;  %v4335_v61 = vld [vmem:[#allocation7 + $0x38] sm:$0xff]   ;;  %v2530_v49 = vadd.f32 %v4629_v13, %v4623_v52  ;;  %v3027_v54 = vsub.s32 2, %v4635_v37  ;;  %v4362_v52 = vld [vmem:[#allocation7 + $0xc0] sm:$0xff]  }
 0x1a6   :  { %2943 = vmatprep.subr.bf16.mxu1 %v4138_v16  ;;  %v2617_v16 = vpop.f32.mrf.mxu1 }
 0x1a7   :  { %v3074_v2 = vpack.c.bf16 %v3066_v60, %v3058_v56  ;;  %v4361_v60 = vld [vmem:[#allocation7 + $0x40] sm:$0xff]  }
 0x1a8   :  { %2901 = vmatpush2.bf16.msra.mxu0 %v4009_v4 }
 0x1a9   :  { %2944 = vmatpush2.bf16.msra.mxu1 %v4137_v5  ;;  %2902 = vmatprep.subr.bf16.mxu0 %v4002_v6  ;;  %v4339_v5 = vld [vmem:[#allocation7 + $0x30] sm:$0xff]  }
 0x1aa   :  { %2945 = vmatprep.subr.bf16.mxu1 %v4130_v7  ;;  %v4340_v7 = vld [vmem:[#allocation7 + $0xb0] sm:$0xff]  }
 0x1ac   :  { %2903 = vmatpush2.bf16.msra.mxu0 %v4001_v15 }
 0x1ad   :  { %2946 = vmatpush2.bf16.msra.mxu1 %v4129_v17  ;;  %2904 = vmatprep.subr.bf16.mxu0 %v3994_v18  ;;  %v4343_v18 = vld [vmem:[#allocation7 + $0x28] sm:$0xff]  }
 0x1ae   :  { %2947 = vmatprep.subr.bf16.mxu1 %v4122_v19  ;;  %v4344_v19 = vld [vmem:[#allocation7 + $0xa8] sm:$0xff]  }
 0x1b0   :  { %2905 = vmatpush2.bf16.msra.mxu0 %v3993_v28 }
 0x1b1   :  { %2948 = vmatpush2.bf16.msra.mxu1 %v4121_v29  ;;  %2906 = vmatprep.subr.bf16.mxu0 %v3986_v30  ;;  %v4347_v29 = vld [vmem:[#allocation7 + $0x20] sm:$0xff]  }
 0x1b2   :  { %2949 = vmatprep.subr.bf16.mxu1 %v4114_v33  ;;  %v4348_v30 = vld [vmem:[#allocation7 + $0xa0] sm:$0xff]   ;;  %v4349_v33 = vld [vmem:[#allocation7 + $0x58] sm:$0xff]  }
 0x1b4   :  { %2907 = vmatpush2.bf16.msra.mxu0 %v3985_v42  ;;  %v4352_v42 = vld [vmem:[#allocation7 + $0x98] sm:$0xff]  }
 0x1b5   :  { %2950 = vmatpush2.bf16.msra.mxu1 %v4113_v46  ;;  %2908 = vmatprep.subr.bf16.mxu0 %v3978_v47  ;;  %v4355_v46 = vld [vmem:[#allocation7 + $0x10] sm:$0xff]  }
 0x1b6   :  { %2951 = vmatprep.subr.bf16.mxu1 %v4106_v32  ;;  %v4356_v47 = vld [vmem:[#allocation7 + $0x90] sm:$0xff]  }
 0x1b8   :  { %2909 = vmatpush2.bf16.msra.mxu0 %v3977_v51  ;;  %v3019_v51 = vsub.s32 0, %v4635_v37 }
 0x1b9   :  { %2952 = vmatpush2.bf16.msra.mxu1 %v4105_v39  ;;  %4228 = vmatprep.subr.bf16.mxu0 %v4333_v55  ;;  %v4359_v39 = vld [vmem:[#allocation7 + $0x8] sm:$0xff]   ;;  %v2526_v55 = vadd.f32 %v4625_v58, %v4619_v35  ;;  %v4364_v58 = vld [vmem:[#allocation7 + $0x80] sm:$0xff]  }
 0x1ba   :  { %4250 = vmatprep.subr.bf16.mxu1 %v4334_v12  ;;  %v2573_v12 = vadd.f32 %v4631_v27, %v2530_v49  ;;  %v4365_v27 = vld [vmem:[#allocation7 + $0x178] sm:$0xff]  }
 0x1bb   :  { %v4644_v0 = vpop.f32.mrf.mxu0  ;;  %2911 = vmatmul.mubr.bf16.vlgmr.msra.gmra.mxu0 %v4403_v1  ;;  %v2569_v13 = vadd.f32 %v4627_v3, %v2526_v55  ;;  %v4366_v3 = vld [vmem:[#allocation7 + $0x138] sm:$0xff]  }
 0x1bc   :  { %v4649_v4 = vpop.f32.mrf.mxu1  ;;  %2954 = vmatmul.mubr.bf16.vlgmr.msra.gmra.mxu1 %v4613_v45  ;;  %4229 = vmatpush3.bf16.msra.mxu0 %v4335_v61  ;;  %v2655_v53 = vadd.f32 %v4644_v0, %v4633_v31  ;;  %v3020_v31 = vrot.slane %v4639_v50, %v3019_v51  ;;  %v3039_v51 = vsub.s32 5, %v4635_v37 }
 0x1bd   :  { %3632 = vmatprep.mubr.bf16.mxu0 %v3074_v2  ;;  %4251 = vmatpush3.bf16.msra.mxu1 %v4336_v62  ;;  %v2656_v6 = vpop.f32.mrf.mxu0  ;;  %v3028_v62 = vrot.slane %v4639_v50, %v3027_v54  ;;  %v3035_v54 = vsub.s32 4, %v4635_v37 }
 0x1be   :  { %v2657_v9 = vadd.f32 %v2656_v6, %v2613_v22  ;;  %v2699_v10 = vpop.f32.mrf.mxu1  ;;  %4230 = vmatprep.subr.bf16.mxu0 %v4337_v63  ;;  %4252 = vmatprep.subr.bf16.mxu1 %v4338_v59  ;;  %v4357_v22 = vld [vmem:[#allocation7 + $0x48] sm:$0xff]   ;;  %v2698_v56 = vadd.f32 %v4649_v4, %v2655_v53  ;;  %v3065_v35 = vadd.f32 %v3020_v31, %v2573_v12  ;;  %v4381_v59 = vld [vmem:[#allocation7 + $0x1f8] sm:$0xff]   ;;  %v4367_v4 = vld [vmem:[#allocation7 + $0x170] sm:$0xff]  }
 0x1bf   :  { %v2658_v15 = vpop.f32.mrf.mxu0  ;;  %v3057_v0 = vadd.f32 %v3020_v31, %v2569_v13  ;;  %v3040_v13 = vrot.slane %v4639_v50, %v3039_v51 }
 0x1c0   :  { %v2701_v17 = vpop.f32.mrf.mxu1  ;;  %4231 = vmatpush3.bf16.msra.mxu0 %v4339_v5  ;;  %v2700_v21 = vadd.f32 %v2699_v10, %v2657_v9  ;;  %v2659_v32 = vadd.f32 %v2658_v15, %v4642_v57  ;;  %v4360_v57 = vld [vmem:[#allocation7 + $0x88] sm:$0xff]   ;;  %v3059_v1 = vadd.f32 %v3028_v62, %v2698_v56  ;;  %v4382_v5 = vld [vmem:[#allocation7 + $0x1b8] sm:$0xff]   ;;  %v4384_v10 = vld [vmem:[#allocation7 + $0x1b0] sm:$0xff]  }
 0x1c1   :  { %4253 = vmatpush3.bf16.msra.mxu1 %v4340_v7  ;;  %v2660_v45 = vpop.f32.mrf.mxu0  ;;  %4232 = vmatprep.subr.bf16.mxu0 %v4341_v8  ;;  %v3073_v2 = vpack.c.bf16 %v3065_v35, %v3057_v0  ;;  %v4383_v7 = vld [vmem:[#allocation7 + $0x1f0] sm:$0xff]   ;;  %v4369_v9 = vld [vmem:[#allocation7 + $0x168] sm:$0xff]   ;;  %v4371_v15 = vld [vmem:[#allocation7 + $0x160] sm:$0xff]  }
 0x1c2   :  { %v2661_v24 = vadd.f32 %v2660_v45, %v2617_v16  ;;  %4254 = vmatprep.subr.bf16.mxu1 %v4342_v14  ;;  %v2703_v26 = vpop.f32.mrf.mxu1  ;;  %v3060_v34 = vadd.f32 %v3032_v23, %v2700_v21  ;;  %v2702_v61 = vadd.f32 %v2701_v17, %v2659_v32  ;;  %v4363_v16 = vld [vmem:[#allocation7] sm:$0xff]   ;;  %v4368_v8 = vld [vmem:[#allocation7 + $0x130] sm:$0xff]   ;;  %v4370_v14 = vld [vmem:[#allocation7 + $0x128] sm:$0xff]  }
 0x1c3   :  { %v4386_v17 = vld [vmem:[#allocation7 + $0x1a8] sm:$0xff]   ;;  %v4372_v45 = vld [vmem:[#allocation7 + $0x120] sm:$0xff]   ;;  %v4374_v21 = vld [vmem:[#allocation7 + $0x118] sm:$0xff]  }
 0x1c4   :  { %v2704_v28 = vadd.f32 %v2703_v26, %v2661_v24  ;;  %4233 = vmatpush3.bf16.msra.mxu0 %v4343_v18  ;;  %v3067_v63 = vadd.f32 %v3028_v62, %v2702_v61  ;;  %v4387_v18 = vld [vmem:[#allocation7 + $0x1e0] sm:$0xff]   ;;  %v4376_v24 = vld [vmem:[#allocation7 + $0x110] sm:$0xff]   ;;  %v4378_v26 = vld [vmem:[#allocation7 + $0x108] sm:$0xff]   ;;  %v3036_v62 = vrot.slane %v4639_v50, %v3035_v54 }
 0x1c5   :  { %4255 = vmatpush3.bf16.msra.mxu1 %v4344_v19  ;;  %4234 = vmatprep.subr.bf16.mxu0 %v4345_v20  ;;  %v4373_v19 = vld [vmem:[#allocation7 + $0x158] sm:$0xff]   ;;  %v4388_v20 = vld [vmem:[#allocation7 + $0x1a0] sm:$0xff]  }
 0x1c6   :  { %v3068_v36 = vadd.f32 %v3032_v23, %v2704_v28  ;;  %4256 = vmatprep.subr.bf16.mxu1 %v4346_v25  ;;  %v3075_v6 = vpack.c.bf16 %v3067_v63, %v3059_v1  ;;  %v4375_v23 = vld [vmem:[#allocation7 + $0x150] sm:$0xff]   ;;  %v4377_v25 = vld [vmem:[#allocation7 + $0x148] sm:$0xff]   ;;  %v4379_v28 = vld [vmem:[#allocation7 + $0x140] sm:$0xff]  }
 0x1c8   :  { %4235 = vmatpush3.bf16.msra.mxu0 %v4347_v29  ;;  %v3076_v40 = vpack.c.bf16 %v3068_v36, %v3060_v34  ;;  %v4380_v29 = vld [vmem:[#allocation7 + $0x100] sm:$0xff]   ;;  %v4391_v34 = vld [vmem:[#allocation7 + $0x1d0] sm:$0xff]  }
 0x1c9   :  { %4257 = vmatpush3.bf16.msra.mxu1 %v4348_v30  ;;  %4236 = vmatprep.subr.bf16.mxu0 %v4349_v33  ;;  %v4389_v30 = vld [vmem:[#allocation7 + $0x1d8] sm:$0xff]   ;;  %v4392_v36 = vld [vmem:[#allocation7 + $0x190] sm:$0xff]  }
 0x1ca   :  { %3673 = vmatprep.mubr.bf16.mxu1 %v3076_v40  ;;  %4258 = vmatprep.subr.bf16.mxu1 %v4350_v38  ;;  %v4390_v33 = vld [vmem:[#allocation7 + $0x198] sm:$0xff]   ;;  %v4393_v38 = vld [vmem:[#allocation7 + $0x1c8] sm:$0xff]  }
 0x1cb   :  { %v4394_v40 = vld [vmem:[#allocation7 + $0x188] sm:$0xff]  }
 0x1cc   :  { %4237 = vmatpush3.bf16.msra.mxu0 %v4351_v41  ;;  %v4395_v41 = vld [vmem:[#allocation7 + $0x1c0] sm:$0xff]  }
 0x1cd   :  { %4259 = vmatpush3.bf16.msra.mxu1 %v4352_v42  ;;  %4238 = vmatprep.subr.bf16.mxu0 %v4353_v43  ;;  %v4396_v42 = vld [vmem:[#allocation7 + $0x180] sm:$0xff]  }
 0x1ce   :  { %4260 = vmatprep.subr.bf16.mxu1 %v4354_v44 }
 0x1d0   :  { %4239 = vmatpush3.bf16.msra.mxu0 %v4355_v46 }
 0x1d1   :  { %4261 = vmatpush3.bf16.msra.mxu1 %v4356_v47  ;;  %4240 = vmatprep.subr.bf16.mxu0 %v4357_v22 }
 0x1d2   :  { %4262 = vmatprep.subr.bf16.mxu1 %v4358_v48 }
 0x1d4   :  { %4241 = vmatpush3.bf16.msra.mxu0 %v4359_v39 }
 0x1d5   :  { %4263 = vmatpush3.bf16.msra.mxu1 %v4360_v57  ;;  %4242 = vmatprep.subr.bf16.mxu0 %v4361_v60 }
 0x1d6   :  { %4264 = vmatprep.subr.bf16.mxu1 %v4362_v52 }
 0x1d8   :  { %4243 = vmatpush3.bf16.msra.mxu0 %v4363_v16 }
 0x1d9   :  { %4265 = vmatpush3.bf16.msra.mxu1 %v4364_v58  ;;  %4272 = vmatprep.subr.bf16.mxu0 %v4365_v27 }
 0x1da   :  { %4294 = vmatprep.subr.bf16.mxu1 %v4381_v59 }
 0x1db   :  { %3633 = vmatmul.mubr.bf16.vlgmr.msra.gmra.mxu0 %v3073_v2 }
 0x1dc   :  { %3674 = vmatmul.mubr.bf16.vlgmr.msra.gmra.mxu1 %v3075_v6  ;;  %4273 = vmatpush3.bf16.msra.mxu0 %v4366_v3 }
 0x1dd   :  { %4274 = vmatprep.subr.bf16.mxu0 %v4367_v4  ;;  %4295 = vmatpush3.bf16.msra.mxu1 %v4382_v5 }
 0x1de   :  { %4296 = vmatprep.subr.bf16.mxu1 %v4383_v7 }
 0x1e0   :  { %4275 = vmatpush3.bf16.msra.mxu0 %v4368_v8 }
 0x1e1   :  { %4276 = vmatprep.subr.bf16.mxu0 %v4369_v9  ;;  %4297 = vmatpush3.bf16.msra.mxu1 %v4384_v10 }
 0x1e2   :  { %4298 = vmatprep.subr.bf16.mxu1 %v4385_v11  ;;  %v3047_v11 = vsub.s32 7, %v4635_v37 }
 0x1e4   :  { %4277 = vmatpush3.bf16.msra.mxu0 %v4370_v14 }
 0x1e5   :  { %4278 = vmatprep.subr.bf16.mxu0 %v4371_v15  ;;  %4299 = vmatpush3.bf16.msra.mxu1 %v4386_v17  ;;  %v3043_v15 = vsub.s32 6, %v4635_v37 }
 0x1e6   :  { %4300 = vmatprep.subr.bf16.mxu1 %v4387_v18 }
 0x1e8   :  { %4279 = vmatpush3.bf16.msra.mxu0 %v4372_v45 }
 0x1e9   :  { %4280 = vmatprep.subr.bf16.mxu0 %v4373_v19  ;;  %4301 = vmatpush3.bf16.msra.mxu1 %v4388_v20 }
 0x1ea   :  { %4302 = vmatprep.subr.bf16.mxu1 %v4389_v30 }
 0x1ec   :  { %4281 = vmatpush3.bf16.msra.mxu0 %v4374_v21  ;;  %v3048_v21 = vrot.slane %v4639_v50, %v3047_v11 }
 0x1ed   :  { %4282 = vmatprep.subr.bf16.mxu0 %v4375_v23  ;;  %4303 = vmatpush3.bf16.msra.mxu1 %v4390_v33 }
 0x1ee   :  { %4304 = vmatprep.subr.bf16.mxu1 %v4391_v34 }
 0x1f0   :  { %4283 = vmatpush3.bf16.msra.mxu0 %v4376_v24 }
 0x1f1   :  { %4284 = vmatprep.subr.bf16.mxu0 %v4377_v25  ;;  %4305 = vmatpush3.bf16.msra.mxu1 %v4392_v36 }
 0x1f2   :  { %4306 = vmatprep.subr.bf16.mxu1 %v4393_v38 }
 0x1f4   :  { %4285 = vmatpush3.bf16.msra.mxu0 %v4378_v26  ;;  %v3044_v26 = vrot.slane %v4639_v50, %v3043_v15  ;;  %v4163_v50 = vld [vmem:[#allocation8] ss:$0 sm:$0xff] }
 0x1f5   :  { %4286 = vmatprep.subr.bf16.mxu0 %v4379_v28  ;;  %4307 = vmatpush3.bf16.msra.mxu1 %v4394_v40 }
 0x1f6   :  { %4308 = vmatprep.subr.bf16.mxu1 %v4395_v41 }
 0x1f8   :  { %4287 = vmatpush3.bf16.msra.mxu0 %v4380_v29 }
 0x1f9   :  { %4309 = vmatpush3.bf16.msra.mxu1 %v4396_v42 }
 0x1fb   :  { %v2740_v43 = vpop.f32.mrf.mxu0 }
 0x1fc   :  { %v2783_v44 = vpop.f32.mrf.mxu1 }
 0x1fd   :  { %v2742_v46 = vpop.f32.mrf.mxu0  ;;  %v2784_v57 = vadd.f32 %v2783_v44, %v2740_v43 }
 0x1fe   :  { %v2785_v47 = vpop.f32.mrf.mxu1 }
 0x1ff   :  { %v2744_v22 = vpop.f32.mrf.mxu0  ;;  %v2786_v55 = vadd.f32 %v2785_v47, %v2742_v46 }
 0x200   :  { %v2787_v32 = vpop.f32.mrf.mxu1 }
 0x201   :  { %v2746_v48 = vpop.f32.mrf.mxu0  ;;  %v2788_v12 = vadd.f32 %v2787_v32, %v2744_v22 }
 0x202   :  { %v2789_v53 = vpop.f32.mrf.mxu1 }
 0x203   :  { %v2790_v61 = vadd.f32 %v2789_v53, %v2746_v48 }
 0x23b   :  { %v2826_v49 = vpop.f32.mrf.mxu0 }
 0x23c   :  { %v2827_v56 = vadd.f32 %v2826_v49, %v2784_v57  ;;  %v2869_v3 = vpop.f32.mrf.mxu1 }
 0x23d   :  { %v2828_v39 = vpop.f32.mrf.mxu0 }
 0x23e   :  { %v2829_v52 = vadd.f32 %v2828_v39, %v2786_v55  ;;  %v3061_v59 = vadd.f32 %v3036_v62, %v2827_v56  ;;  %v2871_v2 = vpop.f32.mrf.mxu1 }
 0x23f   :  { %v2830_v60 = vpop.f32.mrf.mxu0 }
 0x240   :  { %v2831_v31 = vadd.f32 %v2830_v60, %v2788_v12  ;;  %v3062_v27 = vadd.f32 %v3040_v13, %v2829_v52  ;;  %v2873_v4 = vpop.f32.mrf.mxu1 }
 0x241   :  { %v2832_v16 = vpop.f32.mrf.mxu0 }
 0x242   :  { %v2833_v35 = vadd.f32 %v2832_v16, %v2790_v61  ;;  %v3069_v58 = vadd.f32 %v3036_v62, %v2831_v31  ;;  %v2875_v5 = vpop.f32.mrf.mxu1 }
 0x244   :  { %v3070_v63 = vadd.f32 %v3040_v13, %v2833_v35  ;;  %v3077_v1 = vpack.c.bf16 %v3069_v58, %v3061_v59 }
 0x246   :  { %v3078_v0 = vpack.c.bf16 %v3070_v63, %v3062_v27 }
 0x248   :  { %3714 = vmatprep.mubr.bf16.mxu0 %v3078_v0 }
 0x249   :  { %3715 = vmatmul.mubr.bf16.vlgmr.msra.gmra.mxu0 %v3077_v1 }
 0x27b   :  { %v2912_v6 = vpop.f32.mrf.mxu0 }
 0x27c   :  { %v2955_v7 = vpop.f32.mrf.mxu1  ;;  %v2913_v14 = vadd.f32 %v2912_v6, %v2869_v3 }
 0x27d   :  { %v2914_v8 = vpop.f32.mrf.mxu0 }
 0x27e   :  { %v2915_v9 = vadd.f32 %v2914_v8, %v2871_v2  ;;  %v2957_v10 = vpop.f32.mrf.mxu1  ;;  %v2956_v25 = vadd.f32 %v2955_v7, %v2913_v14 }
 0x27f   :  { %v2916_v17 = vpop.f32.mrf.mxu0 }
 0x280   :  { %v2917_v18 = vadd.f32 %v2916_v17, %v2873_v4  ;;  %v2959_v45 = vpop.f32.mrf.mxu1  ;;  %v2958_v20 = vadd.f32 %v2957_v10, %v2915_v9  ;;  %v3063_v36 = vadd.f32 %v3044_v26, %v2956_v25 }
 0x281   :  { %v2918_v19 = vpop.f32.mrf.mxu0 }
 0x282   :  { %v2960_v23 = vadd.f32 %v2959_v45, %v2917_v18  ;;  %v2919_v24 = vadd.f32 %v2918_v19, %v2875_v5  ;;  %v2961_v28 = vpop.f32.mrf.mxu1  ;;  %v3064_v33 = vadd.f32 %v3048_v21, %v2958_v20 }
 0x284   :  { %v2962_v29 = vadd.f32 %v2961_v28, %v2919_v24  ;;  %v3071_v30 = vadd.f32 %v3044_v26, %v2960_v23 }
 0x286   :  { %v3072_v34 = vadd.f32 %v3048_v21, %v2962_v29  ;;  %v3079_v37 = vpack.c.bf16 %v3071_v30, %v3063_v36 }
 0x288   :  { %v3080_v38 = vpack.c.bf16 %v3072_v34, %v3064_v33 }
 0x28a   :  { %3755 = vmatprep.mubr.bf16.mxu1 %v3080_v38 }
 0x28b   :  { %3756 = vmatmul.mubr.bf16.vlgmr.msra.gmra.mxu1 %v3079_v37 }
 0x29b   :  { %v4244_v40 = vpop.f32.mrf.mxu0 }
 0x29c   :  { %v4266_v43 = vpop.f32.mrf.mxu1 }
 0x29d   :  { %v4245_v41 = vpop.f32.mrf.mxu0 }
 0x29e   :  { %v4267_v47 = vpop.f32.mrf.mxu1  ;;  %v4246_v32 = vadd.f32 %v4245_v41, %v4244_v40 }
 0x29f   :  { %v4247_v42 = vpop.f32.mrf.mxu0  ;;  %v4268_v39 = vadd.f32 %v4267_v47, %v4266_v43 }
 0x2a0   :  { %v4269_v48 = vpop.f32.mrf.mxu1  ;;  %v3635_v51 = vadd.f32 %v4246_v32, %v4163_v50 }
 0x2a1   :  { %v4248_v44 = vpop.f32.mrf.mxu0 }
 0x2a2   :  { %v4249_v53 = vadd.f32 %v4248_v44, %v4247_v42  ;;  %v4270_v54 = vpop.f32.mrf.mxu1  ;;  %v3676_v60 = vadd.f32 %v4268_v39, %v3635_v51 }
 0x2a3   :  { %v4271_v13 = vadd.f32 %v4270_v54, %v4269_v48 }
 0x2a4   :  { %v3638_v61 = vadd.f32 %v4249_v53, %v4163_v50 }
 0x2a6   :  { %v3679_v35 = vadd.f32 %v4271_v13, %v3638_v61 }
 0x309   :  { %v4288_v46 = vpop.f32.mrf.mxu0 }
 0x30b   :  { %v4289_v22 = vpop.f32.mrf.mxu0 }
 0x30c   :  { %v4290_v55 = vadd.f32 %v4289_v22, %v4288_v46 }
 0x30d   :  { %v4291_v49 = vpop.f32.mrf.mxu0 }
 0x30e   :  { %v3717_v31 = vadd.f32 %v4290_v55, %v3676_v60 }
 0x30f   :  { %v4292_v12 = vpop.f32.mrf.mxu0 }
 0x310   :  { %v4293_v56 = vadd.f32 %v4292_v12, %v4291_v49 }
 0x312   :  { %v3720_v63 = vadd.f32 %v4293_v56, %v3679_v35 }
 0x34b   :  { %v4310_v57 = vpop.f32.mrf.mxu1 }
 0x34d   :  { %v4311_v52 = vpop.f32.mrf.mxu1 }
 0x34e   :  { %v4312_v62 = vadd.f32 %v4311_v52, %v4310_v57 }
 0x34f   :  { %v4313_v16 = vpop.f32.mrf.mxu1 }
 0x350   :  { %v3758_v58 = vadd.f32 %v4312_v62, %v3717_v31 }
 0x351   :  { %v4314_v27 = vpop.f32.mrf.mxu1 }
 0x352   :  { %3764 = vst [vmem:[%s4687_s5] sm:$0xff] %v3758_v58  ;;  %v4315_v59 = vadd.f32 %v4314_v27, %v4313_v16 }
 0x354   :  { %v3761_v0 = vadd.f32 %v4315_v59, %v3720_v63 }
 0x356   :  { %3765 = vst [vmem:[%s4687_s5 + $0x8] sm:$0xff] %v3761_v0 }
 0x357   :  { %3770 = vsyncpa [#allocation4], 1 }
 0x358   :  { %3771 = vsyncpa [#allocation6], 1 }
 0x359   :  { %3772 = vsyncpa [#allocation9], 1 }

</bundles_post_ra>
